<compile_context>
chip_gen: v7x
topology: tpu7x:2x2x1
jax: 0.10.0
libtpu: 0.0.40
codegen_flags: <defaults>
</compile_context>

<pallas_src>
import jax
import jax.numpy as jnp
from jax import lax
from jax.experimental import pallas as pl
from jax.experimental.pallas import tpu as pltpu

LANE = 128


def _round_up(n, m):
    return ((n + m - 1) // m) * m


# ---------------------------------------------------------------------------
# Fused kernel: conv matmul + ReLU -> MaxPool(3,2,1) -> GAP -> heads
# ---------------------------------------------------------------------------
def _fused_forward_kernel(p_ref, date_ref, wc_ref, bc_ref, wi_ref, bi_ref,
                          wd_ref, bd_ref, wci_ref, wcd_ref, bcl_ref,
                          o_ref, act_ref):
    # p_ref:   [1, Sp, K]        per-image im2col patches
    # act_ref: [Ho+2, Wo+2, Cp]  VMEM scratch (spatially padded activation)
    hp, wp, cp = act_ref.shape
    ho, wo = hp - 2, wp - 2
    po = (ho - 1) // 2 + 1          # MaxPool2d(k=3, s=2, pad=1) output size
    qo = (wo - 1) // 2 + 1

    # Conv2d(k=7, s=2) as an MXU matmul, f32 accumulation, bias+ReLU in f32.
    y = jnp.dot(p_ref[0], wc_ref[...], preferred_element_type=jnp.float32)
    y = jnp.maximum(y + bc_ref[...], 0.0)                      # [Sp, Cp] f32

    # Scatter the valid Ho*Wo conv rows into a zero-initialised, spatially
    # padded scratch.  Post-ReLU activations are >= 0, so zero padding is
    # equivalent to the -inf padding PyTorch's MaxPool2d uses.
    act_ref[...] = jnp.zeros_like(act_ref)
    for i in range(ho):
        act_ref[1 + i, 1:1 + wo, :] = y[i * wo:(i + 1) * wo, :]

    # MaxPool2d(3, 2, pad=1) + AdaptiveAvgPool2d(1), fully in VMEM.
    gap = jnp.zeros((1, cp), jnp.float32)
    for p in range(po):
        rows = jnp.max(act_ref[2 * p:2 * p + 3], axis=0)       # [Wp, Cp]
        for q in range(qo):
            gap = gap + jnp.max(rows[2 * q:2 * q + 3, :], axis=0,
                                keepdims=True)
    gap = gap * (1.0 / (po * qo))                               # [1, Cp]

    # img / date heads + classifier (concat folded into a split matmul).
    img = jnp.maximum(
        jnp.dot(gap, wi_ref[...], preferred_element_type=jnp.float32)
        + bi_ref[...], 0.0)                                     # [1, 6]
    dte = jnp.maximum(
        jnp.dot(date_ref[0], wd_ref[...], preferred_element_type=jnp.float32)
        + bd_ref[...], 0.0)                                     # [1, 2]
    out = (jnp.dot(img, wci_ref[...], preferred_element_type=jnp.float32)
           + jnp.dot(dte, wcd_ref[...], preferred_element_type=jnp.float32)
           + bcl_ref[...])                                      # [1, 2]
    o_ref[0] = out.astype(o_ref.dtype)


# ---------------------------------------------------------------------------
# Full forward (default config: layers=[], normalize_input=False)
# ---------------------------------------------------------------------------
def image_date_regression_forward(x, date_feature, params, *,
                                  compute_dtype=jnp.float32):
    B, C, H, W = x.shape
    w_conv, b_conv = params["w_conv"], params["b_conv"]
    O, _, kh, kw = w_conv.shape
    stride = 2
    Ho = (H - kh) // stride + 1
    Wo = (W - kw) // stride + 1
    S, K = Ho * Wo, C * kh * kw

    # TODO(synk): normalize_input=True (torchvision Normalize) and non-default
    # `layers` (Block = two 3x3 conv+ReLU + MaxPool2d(2)) are not implemented;
    # the default config uses neither, and Dropout is unused in forward().

    # im2col (wrapper-side layout plumbing); column order C-major, (di,dj)-minor
    # matches the OIHW weight flattening below.
    cols = []
    for di in range(kh):
        for dj in range(kw):
            cols.append(x[:, :, di:di + stride * Ho:stride,
                            dj:dj + stride * Wo:stride])
    patches = jnp.stack(cols, axis=0)              # [kh*kw, B, C, Ho, Wo]
    patches = patches.transpose(1, 3, 4, 2, 0)     # [B, Ho, Wo, C, kh*kw]
    patches = patches.reshape(B, S, K)
    Sp = _round_up(S, 8)                           # ~4% rows, 8-aligned matmul M
    patches = jnp.pad(patches, ((0, 0), (0, Sp - S), (0, 0)))
    patches = patches.astype(compute_dtype)

    # Lane-dense conv channel count (only ever lives in VMEM inside the kernel).
    Cp = _round_up(O, LANE)
    w_mat = jnp.zeros((K, Cp), compute_dtype).at[:, :O].set(
        w_conv.reshape(O, K).T.astype(compute_dtype))
    b_row = jnp.zeros((1, Cp), jnp.float32).at[0, :O].set(
        b_conv.astype(jnp.float32))
    # Zero-pad img_linear rows so the padded (all-zero) channels contribute 0.
    w_img_p = jnp.zeros((Cp, 6), jnp.float32).at[:O].set(
        params["w_img"].astype(jnp.float32))

    date3 = date_feature.astype(jnp.float32).reshape(B, 1, 4)

    out = pl.pallas_call(
        _fused_forward_kernel,
        out_shape=jax.ShapeDtypeStruct((B, 1, 2), jnp.float32),
        grid_spec=pltpu.PrefetchScalarGridSpec(
            num_scalar_prefetch=0,
            grid=(B,),
            in_specs=[
                pl.BlockSpec((1, Sp, K), lambda b: (b, 0, 0)),   # patches[b]
                pl.BlockSpec((1, 1, 4), lambda b: (b, 0, 0)),    # date[b]
                # Constant-index weight / bias blocks (tiny, VMEM-resident).
                pl.BlockSpec((K, Cp), lambda b: (0, 0)),
                pl.BlockSpec((1, Cp), lambda b: (0, 0)),
                pl.BlockSpec((Cp, 6), lambda b: (0, 0)),
                pl.BlockSpec((1, 6), lambda b: (0, 0)),
                pl.BlockSpec((4, 2), lambda b: (0, 0)),
                pl.BlockSpec((1, 2), lambda b: (0, 0)),
                pl.BlockSpec((6, 2), lambda b: (0, 0)),
                pl.BlockSpec((2, 2), lambda b: (0, 0)),
                pl.BlockSpec((1, 2), lambda b: (0, 0)),
            ],
            out_specs=pl.BlockSpec((1, 1, 2), lambda b: (b, 0, 0)),
            scratch_shapes=[pltpu.VMEM((Ho + 2, Wo + 2, Cp), jnp.float32)],
        ),
        compiler_params=pltpu.CompilerParams(
            dimension_semantics=("parallel",),   # per-image sharding on 2-TC chips
        ),
    )(patches, date3, w_mat, b_row, w_img_p,
      params["b_img"].astype(jnp.float32).reshape(1, 6),
      params["w_date"].astype(jnp.float32),
      params["b_date"].astype(jnp.float32).reshape(1, 2),
      params["w_cls"][:6].astype(jnp.float32),
      params["w_cls"][6:].astype(jnp.float32),
      params["b_cls"].astype(jnp.float32).reshape(1, 2))

    return out.reshape(B, 2)


# ---------------------------------------------------------------------------
# Parameters (stored in matmul layout: [in, out]) and pure-JAX reference
# ---------------------------------------------------------------------------
def init_params(key, n_input_channels=3, dtype=jnp.float32):
    ks = jax.random.split(key, 8)
    c = 32
    return dict(
        w_conv=0.1 * jax.random.normal(ks[0], (c, n_input_channels, 7, 7), dtype),  # OIHW
        b_conv=0.1 * jax.random.normal(ks[1], (c,), dtype),
        w_img=0.1 * jax.random.normal(ks[2], (c, 6), dtype),
        b_img=0.1 * jax.random.normal(ks[3], (6,), dtype),
        w_date=0.1 * jax.random.normal(ks[4], (4, 2), dtype),
        b_date=0.1 * jax.random.normal(ks[5], (2,), dtype),
        w_cls=0.1 * jax.random.normal(ks[6], (8, 2), dtype),
        b_cls=0.1 * jax.random.normal(ks[7], (2,), dtype),
    )


def reference_forward(x, date, params):
    y = lax.conv_general_dilated(x, params["w_conv"], window_strides=(2, 2),
                                 padding="VALID",
                                 dimension_numbers=("NCHW", "OIHW", "NCHW"))
    y = jnp.maximum(y + params["b_conv"][None, :, None, None], 0.0)
    y = lax.reduce_window(y, -jnp.inf, lax.max,
                          window_dimensions=(1, 1, 3, 3),
                          window_strides=(1, 1, 2, 2),
                          padding=((0, 0), (0, 0), (1, 1), (1, 1)))
    g = jnp.mean(y, axis=(2, 3))                                  # GAP
    img = jnp.maximum(g @ params["w_img"] + params["b_img"], 0.0)
    dt = jnp.maximum(date @ params["w_date"] + params["b_date"], 0.0)
    cat = jnp.concatenate([img, dt], axis=1)
    return cat @ params["w_cls"] + params["b_cls"]


if __name__ == "__main__":
    key = jax.random.PRNGKey(0)
    kx, kd, kp = jax.random.split(key, 3)

    B, C, H, W = 2, 3, 32, 32
    x = jax.random.normal(kx, (B, C, H, W), jnp.float32)
    date_feature = jax.random.normal(kd, (B, 4), jnp.float32)
    params = init_params(kp, n_input_channels=C)

    ref = reference_forward(x, date_feature, params)

    # f32-operand path (all generations).
    fwd = jax.jit(image_date_regression_forward)
    out = jax.block_until_ready(fwd(x, date_feature, params))
    assert out.shape == (B, 2)
    assert jnp.allclose(out, ref, atol=1e-3, rtol=1e-3), \
        f"f32 max abs err {float(jnp.max(jnp.abs(out - ref)))}"

    # bf16-operand path (recommended for v6e/v7x: half the patch DMA bytes,
    # bf16-native MXU); accumulation and the whole epilogue stay in f32.
    fwd_bf16 = jax.jit(lambda a, d, p: image_date_regression_forward(
        a, d, p, compute_dtype=jnp.bfloat16))
    out_bf16 = jax.block_until_ready(fwd_bf16(x, date_feature, params))
    assert jnp.allclose(out_bf16, ref, atol=5e-2, rtol=5e-2), \
        f"bf16 max abs err {float(jnp.max(jnp.abs(out_bf16 - ref)))}"

    print("KERNEL_OK")
</pallas_src>

<mosaic_0001>
module attributes {stable_mosaic.version = 11 : i64} {
  func.func @_fused_forward_kernel(%arg0: i32, %arg1: memref<1x176x147xf32, #tpu.memory_space<vmem>>, %arg2: memref<1x1x4xf32, #tpu.memory_space<vmem>>, %arg3: memref<147x128xf32, #tpu.memory_space<vmem>>, %arg4: memref<1x128xf32, #tpu.memory_space<vmem>>, %arg5: memref<128x6xf32, #tpu.memory_space<vmem>>, %arg6: memref<1x6xf32, #tpu.memory_space<vmem>>, %arg7: memref<4x2xf32, #tpu.memory_space<vmem>>, %arg8: memref<1x2xf32, #tpu.memory_space<vmem>>, %arg9: memref<6x2xf32, #tpu.memory_space<vmem>>, %arg10: memref<2x2xf32, #tpu.memory_space<vmem>>, %arg11: memref<1x2xf32, #tpu.memory_space<vmem>>, %arg12: memref<1x1x2xf32, #tpu.memory_space<vmem>>, %arg13: memref<15x15x128xf32, #tpu.memory_space<vmem>>) attributes {dimension_semantics = [#tpu.dimension_semantics<parallel>], iteration_bounds = array<i64: 2>, scalar_prefetch = 0 : i64, scratch_operands = 1 : i64, tpu.core_type = #tpu.core_type<tc>, window_params = [{transform_indices = @transform_0, window_bounds = array<i64: 1, 176, 147>}, {transform_indices = @transform_1, window_bounds = array<i64: 1, 1, 4>}, {pipeline_mode = #tpu.pipeline_mode<synchronous>, transform_indices = @transform_2, window_bounds = array<i64: 147, 128>}, {pipeline_mode = #tpu.pipeline_mode<synchronous>, transform_indices = @transform_3, window_bounds = array<i64: 1, 128>}, {pipeline_mode = #tpu.pipeline_mode<synchronous>, transform_indices = @transform_4, window_bounds = array<i64: 128, 6>}, {pipeline_mode = #tpu.pipeline_mode<synchronous>, transform_indices = @transform_5, window_bounds = array<i64: 1, 6>}, {pipeline_mode = #tpu.pipeline_mode<synchronous>, transform_indices = @transform_6, window_bounds = array<i64: 4, 2>}, {pipeline_mode = #tpu.pipeline_mode<synchronous>, transform_indices = @transform_7, window_bounds = array<i64: 1, 2>}, {pipeline_mode = #tpu.pipeline_mode<synchronous>, transform_indices = @transform_8, window_bounds = array<i64: 6, 2>}, {pipeline_mode = #tpu.pipeline_mode<synchronous>, transform_indices = @transform_9, window_bounds = array<i64: 2, 2>}, {pipeline_mode = #tpu.pipeline_mode<synchronous>, transform_indices = @transform_10, window_bounds = array<i64: 1, 2>}, {transform_indices = @transform_11, window_bounds = array<i64: 1, 1, 2>}]} {
    %c0 = arith.constant 0 : index
    %c0_0 = arith.constant 0 : index
    %c0_1 = arith.constant 0 : index
    %0 = vector.load %arg1[%c0, %c0_0, %c0_1] : memref<1x176x147xf32, #tpu.memory_space<vmem>>, vector<1x176x147xf32>
    %1 = vector.shape_cast %0 : vector<1x176x147xf32> to vector<176x147xf32>
    %c0_2 = arith.constant 0 : index
    %c0_3 = arith.constant 0 : index
    %2 = vector.load %arg3[%c0_2, %c0_3] : memref<147x128xf32, #tpu.memory_space<vmem>>, vector<147x128xf32>
    %cst = arith.constant dense<0.000000e+00> : vector<176x128xf32>
    %3 = tpu.matmul %1, %2, %cst {dimension_numbers = #tpu.dot_dimension_numbers<[1], [0], [0], [1], [0, 0, 1, 1], [], []>} : vector<176x147xf32>, vector<147x128xf32>, vector<176x128xf32> -> vector<176x128xf32>
    %c0_4 = arith.constant 0 : index
    %c0_5 = arith.constant 0 : index
    %4 = vector.load %arg4[%c0_4, %c0_5] : memref<1x128xf32, #tpu.memory_space<vmem>>, vector<1x128xf32>
    %5 = vector.broadcast %4 : vector<1x128xf32> to vector<176x128xf32>
    %6 = arith.addf %3, %5 : vector<176x128xf32>
    %cst_6 = arith.constant 0.000000e+00 : f32
    %7 = vector.broadcast %cst_6 : f32 to vector<176x128xf32>
    %8 = arith.maximumf %6, %7 : vector<176x128xf32>
    %cst_7 = arith.constant 0.000000e+00 : f32
    %9 = vector.broadcast %cst_7 : f32 to vector<15x15x128xf32>
    %c0_8 = arith.constant 0 : index
    %c0_9 = arith.constant 0 : index
    %c0_10 = arith.constant 0 : index
    %10 = vector.load %arg13[%c0_8, %c0_9, %c0_10] : memref<15x15x128xf32, #tpu.memory_space<vmem>>, vector<15x15x128xf32>
    tpu.vector_store %arg13[%c0_8, %c0_9, %c0_10], %9 {strides = array<i32>} : memref<15x15x128xf32, #tpu.memory_space<vmem>>, vector<15x15x128xf32>,
    %11 = vector.extract_strided_slice %8 {offsets = [0, 0], sizes = [13, 128], strides = [1, 1]} : vector<176x128xf32> to vector<13x128xf32>
    %c1 = arith.constant 1 : index
    %c1_11 = arith.constant 1 : index
    %c0_12 = arith.constant 0 : index
    %12 = vector.load %arg13[%c1, %c1_11, %c0_12] : memref<15x15x128xf32, #tpu.memory_space<vmem>>, vector<1x13x128xf32>
    %13 = vector.shape_cast %12 : vector<1x13x128xf32> to vector<13x128xf32>
    %14 = vector.shape_cast %11 : vector<13x128xf32> to vector<1x13x128xf32>
    tpu.vector_store %arg13[%c1, %c1_11, %c0_12], %14 {strides = array<i32>} : memref<15x15x128xf32, #tpu.memory_space<vmem>>, vector<1x13x128xf32>,
    %15 = vector.extract_strided_slice %8 {offsets = [13, 0], sizes = [13, 128], strides = [1, 1]} : vector<176x128xf32> to vector<13x128xf32>
    %c2 = arith.constant 2 : index
    %c1_13 = arith.constant 1 : index
    %c0_14 = arith.constant 0 : index
    %16 = vector.load %arg13[%c2, %c1_13, %c0_14] : memref<15x15x128xf32, #tpu.memory_space<vmem>>, vector<1x13x128xf32>
    %17 = vector.shape_cast %16 : vector<1x13x128xf32> to vector<13x128xf32>
    %18 = vector.shape_cast %15 : vector<13x128xf32> to vector<1x13x128xf32>
    tpu.vector_store %arg13[%c2, %c1_13, %c0_14], %18 {strides = array<i32>} : memref<15x15x128xf32, #tpu.memory_space<vmem>>, vector<1x13x128xf32>,
    %19 = vector.extract_strided_slice %8 {offsets = [26, 0], sizes = [13, 128], strides = [1, 1]} : vector<176x128xf32> to vector<13x128xf32>
    %c3 = arith.constant 3 : index
    %c1_15 = arith.constant 1 : index
    %c0_16 = arith.constant 0 : index
    %20 = vector.load %arg13[%c3, %c1_15, %c0_16] : memref<15x15x128xf32, #tpu.memory_space<vmem>>, vector<1x13x128xf32>
    %21 = vector.shape_cast %20 : vector<1x13x128xf32> to vector<13x128xf32>
    %22 = vector.shape_cast %19 : vector<13x128xf32> to vector<1x13x128xf32>
    tpu.vector_store %arg13[%c3, %c1_15, %c0_16], %22 {strides = array<i32>} : memref<15x15x128xf32, #tpu.memory_space<vmem>>, vector<1x13x128xf32>,
    %23 = vector.extract_strided_slice %8 {offsets = [39, 0], sizes = [13, 128], strides = [1, 1]} : vector<176x128xf32> to vector<13x128xf32>
    %c4 = arith.constant 4 : index
    %c1_17 = arith.constant 1 : index
    %c0_18 = arith.constant 0 : index
    %24 = vector.load %arg13[%c4, %c1_17, %c0_18] : memref<15x15x128xf32, #tpu.memory_space<vmem>>, vector<1x13x128xf32>
    %25 = vector.shape_cast %24 : vector<1x13x128xf32> to vector<13x128xf32>
    %26 = vector.shape_cast %23 : vector<13x128xf32> to vector<1x13x128xf32>
    tpu.vector_store %arg13[%c4, %c1_17, %c0_18], %26 {strides = array<i32>} : memref<15x15x128xf32, #tpu.memory_space<vmem>>, vector<1x13x128xf32>,
    %27 = vector.extract_strided_slice %8 {offsets = [52, 0], sizes = [13, 128], strides = [1, 1]} : vector<176x128xf32> to vector<13x128xf32>
    %c5 = arith.constant 5 : index
    %c1_19 = arith.constant 1 : index
    %c0_20 = arith.constant 0 : index
    %28 = vector.load %arg13[%c5, %c1_19, %c0_20] : memref<15x15x128xf32, #tpu.memory_space<vmem>>, vector<1x13x128xf32>
    %29 = vector.shape_cast %28 : vector<1x13x128xf32> to vector<13x128xf32>
    %30 = vector.shape_cast %27 : vector<13x128xf32> to vector<1x13x128xf32>
    tpu.vector_store %arg13[%c5, %c1_19, %c0_20], %30 {strides = array<i32>} : memref<15x15x128xf32, #tpu.memory_space<vmem>>, vector<1x13x128xf32>,
    %31 = vector.extract_strided_slice %8 {offsets = [65, 0], sizes = [13, 128], strides = [1, 1]} : vector<176x128xf32> to vector<13x128xf32>
    %c6 = arith.constant 6 : index
    %c1_21 = arith.constant 1 : index
    %c0_22 = arith.constant 0 : index
    %32 = vector.load %arg13[%c6, %c1_21, %c0_22] : memref<15x15x128xf32, #tpu.memory_space<vmem>>, vector<1x13x128xf32>
    %33 = vector.shape_cast %32 : vector<1x13x128xf32> to vector<13x128xf32>
    %34 = vector.shape_cast %31 : vector<13x128xf32> to vector<1x13x128xf32>
    tpu.vector_store %arg13[%c6, %c1_21, %c0_22], %34 {strides = array<i32>} : memref<15x15x128xf32, #tpu.memory_space<vmem>>, vector<1x13x128xf32>,
    %35 = vector.extract_strided_slice %8 {offsets = [78, 0], sizes = [13, 128], strides = [1, 1]} : vector<176x128xf32> to vector<13x128xf32>
    %c7 = arith.constant 7 : index
    %c1_23 = arith.constant 1 : index
    %c0_24 = arith.constant 0 : index
    %36 = vector.load %arg13[%c7, %c1_23, %c0_24] : memref<15x15x128xf32, #tpu.memory_space<vmem>>, vector<1x13x128xf32>
    %37 = vector.shape_cast %36 : vector<1x13x128xf32> to vector<13x128xf32>
    %38 = vector.shape_cast %35 : vector<13x128xf32> to vector<1x13x128xf32>
    tpu.vector_store %arg13[%c7, %c1_23, %c0_24], %38 {strides = array<i32>} : memref<15x15x128xf32, #tpu.memory_space<vmem>>, vector<1x13x128xf32>,
    %39 = vector.extract_strided_slice %8 {offsets = [91, 0], sizes = [13, 128], strides = [1, 1]} : vector<176x128xf32> to vector<13x128xf32>
    %c8 = arith.constant 8 : index
    %c1_25 = arith.constant 1 : index
    %c0_26 = arith.constant 0 : index
    %40 = vector.load %arg13[%c8, %c1_25, %c0_26] : memref<15x15x128xf32, #tpu.memory_space<vmem>>, vector<1x13x128xf32>
    %41 = vector.shape_cast %40 : vector<1x13x128xf32> to vector<13x128xf32>
    %42 = vector.shape_cast %39 : vector<13x128xf32> to vector<1x13x128xf32>
    tpu.vector_store %arg13[%c8, %c1_25, %c0_26], %42 {strides = array<i32>} : memref<15x15x128xf32, #tpu.memory_space<vmem>>, vector<1x13x128xf32>,
    %43 = vector.extract_strided_slice %8 {offsets = [104, 0], sizes = [13, 128], strides = [1, 1]} : vector<176x128xf32> to vector<13x128xf32>
    %c9 = arith.constant 9 : index
    %c1_27 = arith.constant 1 : index
    %c0_28 = arith.constant 0 : index
    %44 = vector.load %arg13[%c9, %c1_27, %c0_28] : memref<15x15x128xf32, #tpu.memory_space<vmem>>, vector<1x13x128xf32>
    %45 = vector.shape_cast %44 : vector<1x13x128xf32> to vector<13x128xf32>
    %46 = vector.shape_cast %43 : vector<13x128xf32> to vector<1x13x128xf32>
    tpu.vector_store %arg13[%c9, %c1_27, %c0_28], %46 {strides = array<i32>} : memref<15x15x128xf32, #tpu.memory_space<vmem>>, vector<1x13x128xf32>,
    %47 = vector.extract_strided_slice %8 {offsets = [117, 0], sizes = [13, 128], strides = [1, 1]} : vector<176x128xf32> to vector<13x128xf32>
    %c10 = arith.constant 10 : index
    %c1_29 = arith.constant 1 : index
    %c0_30 = arith.constant 0 : index
    %48 = vector.load %arg13[%c10, %c1_29, %c0_30] : memref<15x15x128xf32, #tpu.memory_space<vmem>>, vector<1x13x128xf32>
    %49 = vector.shape_cast %48 : vector<1x13x128xf32> to vector<13x128xf32>
    %50 = vector.shape_cast %47 : vector<13x128xf32> to vector<1x13x128xf32>
    tpu.vector_store %arg13[%c10, %c1_29, %c0_30], %50 {strides = array<i32>} : memref<15x15x128xf32, #tpu.memory_space<vmem>>, vector<1x13x128xf32>,
    %51 = vector.extract_strided_slice %8 {offsets = [130, 0], sizes = [13, 128], strides = [1, 1]} : vector<176x128xf32> to vector<13x128xf32>
    %c11 = arith.constant 11 : index
    %c1_31 = arith.constant 1 : index
    %c0_32 = arith.constant 0 : index
    %52 = vector.load %arg13[%c11, %c1_31, %c0_32] : memref<15x15x128xf32, #tpu.memory_space<vmem>>, vector<1x13x128xf32>
    %53 = vector.shape_cast %52 : vector<1x13x128xf32> to vector<13x128xf32>
    %54 = vector.shape_cast %51 : vector<13x128xf32> to vector<1x13x128xf32>
    tpu.vector_store %arg13[%c11, %c1_31, %c0_32], %54 {strides = array<i32>} : memref<15x15x128xf32, #tpu.memory_space<vmem>>, vector<1x13x128xf32>,
    %55 = vector.extract_strided_slice %8 {offsets = [143, 0], sizes = [13, 128], strides = [1, 1]} : vector<176x128xf32> to vector<13x128xf32>
    %c12 = arith.constant 12 : index
    %c1_33 = arith.constant 1 : index
    %c0_34 = arith.constant 0 : index
    %56 = vector.load %arg13[%c12, %c1_33, %c0_34] : memref<15x15x128xf32, #tpu.memory_space<vmem>>, vector<1x13x128xf32>
    %57 = vector.shape_cast %56 : vector<1x13x128xf32> to vector<13x128xf32>
    %58 = vector.shape_cast %55 : vector<13x128xf32> to vector<1x13x128xf32>
    tpu.vector_store %arg13[%c12, %c1_33, %c0_34], %58 {strides = array<i32>} : memref<15x15x128xf32, #tpu.memory_space<vmem>>, vector<1x13x128xf32>,
    %59 = vector.extract_strided_slice %8 {offsets = [156, 0], sizes = [13, 128], strides = [1, 1]} : vector<176x128xf32> to vector<13x128xf32>
    %c13 = arith.constant 13 : index
    %c1_35 = arith.constant 1 : index
    %c0_36 = arith.constant 0 : index
    %60 = vector.load %arg13[%c13, %c1_35, %c0_36] : memref<15x15x128xf32, #tpu.memory_space<vmem>>, vector<1x13x128xf32>
    %61 = vector.shape_cast %60 : vector<1x13x128xf32> to vector<13x128xf32>
    %62 = vector.shape_cast %59 : vector<13x128xf32> to vector<1x13x128xf32>
    tpu.vector_store %arg13[%c13, %c1_35, %c0_36], %62 {strides = array<i32>} : memref<15x15x128xf32, #tpu.memory_space<vmem>>, vector<1x13x128xf32>,
    %cst_37 = arith.constant 0.000000e+00 : f32
    %63 = vector.broadcast %cst_37 : f32 to vector<1x128xf32>
    %c0_38 = arith.constant 0 : index
    %c0_39 = arith.constant 0 : index
    %c0_40 = arith.constant 0 : index
    %64 = vector.load %arg13[%c0_38, %c0_39, %c0_40] : memref<15x15x128xf32, #tpu.memory_space<vmem>>, vector<3x15x128xf32>
    %cst_41 = arith.constant dense<0xFF800000> : vector<15x128xf32>
    %65 = vector.multi_reduction <maximumf>, %64, %cst_41 [0] : vector<3x15x128xf32> to vector<15x128xf32>
    %66 = vector.extract_strided_slice %65 {offsets = [0, 0], sizes = [3, 128], strides = [1, 1]} : vector<15x128xf32> to vector<3x128xf32>
    %cst_42 = arith.constant dense<0xFF800000> : vector<128xf32>
    %67 = vector.multi_reduction <maximumf>, %66, %cst_42 [0] : vector<3x128xf32> to vector<128xf32>
    %68 = vector.shape_cast %67 : vector<128xf32> to vector<1x128xf32>
    %69 = arith.addf %63, %68 : vector<1x128xf32>
    %70 = vector.extract_strided_slice %65 {offsets = [2, 0], sizes = [3, 128], strides = [1, 1]} : vector<15x128xf32> to vector<3x128xf32>
    %cst_43 = arith.constant dense<0xFF800000> : vector<128xf32>
    %71 = vector.multi_reduction <maximumf>, %70, %cst_43 [0] : vector<3x128xf32> to vector<128xf32>
    %72 = vector.shape_cast %71 : vector<128xf32> to vector<1x128xf32>
    %73 = arith.addf %69, %72 : vector<1x128xf32>
    %74 = vector.extract_strided_slice %65 {offsets = [4, 0], sizes = [3, 128], strides = [1, 1]} : vector<15x128xf32> to vector<3x128xf32>
    %cst_44 = arith.constant dense<0xFF800000> : vector<128xf32>
    %75 = vector.multi_reduction <maximumf>, %74, %cst_44 [0] : vector<3x128xf32> to vector<128xf32>
    %76 = vector.shape_cast %75 : vector<128xf32> to vector<1x128xf32>
    %77 = arith.addf %73, %76 : vector<1x128xf32>
    %78 = vector.extract_strided_slice %65 {offsets = [6, 0], sizes = [3, 128], strides = [1, 1]} : vector<15x128xf32> to vector<3x128xf32>
    %cst_45 = arith.constant dense<0xFF800000> : vector<128xf32>
    %79 = vector.multi_reduction <maximumf>, %78, %cst_45 [0] : vector<3x128xf32> to vector<128xf32>
    %80 = vector.shape_cast %79 : vector<128xf32> to vector<1x128xf32>
    %81 = arith.addf %77, %80 : vector<1x128xf32>
    %82 = vector.extract_strided_slice %65 {offsets = [8, 0], sizes = [3, 128], strides = [1, 1]} : vector<15x128xf32> to vector<3x128xf32>
    %cst_46 = arith.constant dense<0xFF800000> : vector<128xf32>
    %83 = vector.multi_reduction <maximumf>, %82, %cst_46 [0] : vector<3x128xf32> to vector<128xf32>
    %84 = vector.shape_cast %83 : vector<128xf32> to vector<1x128xf32>
    %85 = arith.addf %81, %84 : vector<1x128xf32>
    %86 = vector.extract_strided_slice %65 {offsets = [10, 0], sizes = [3, 128], strides = [1, 1]} : vector<15x128xf32> to vector<3x128xf32>
    %cst_47 = arith.constant dense<0xFF800000> : vector<128xf32>
    %87 = vector.multi_reduction <maximumf>, %86, %cst_47 [0] : vector<3x128xf32> to vector<128xf32>
    %88 = vector.shape_cast %87 : vector<128xf32> to vector<1x128xf32>
    %89 = arith.addf %85, %88 : vector<1x128xf32>
    %90 = vector.extract_strided_slice %65 {offsets = [12, 0], sizes = [3, 128], strides = [1, 1]} : vector<15x128xf32> to vector<3x128xf32>
    %cst_48 = arith.constant dense<0xFF800000> : vector<128xf32>
    %91 = vector.multi_reduction <maximumf>, %90, %cst_48 [0] : vector<3x128xf32> to vector<128xf32>
    %92 = vector.shape_cast %91 : vector<128xf32> to vector<1x128xf32>
    %93 = arith.addf %89, %92 : vector<1x128xf32>
    %c2_49 = arith.constant 2 : index
    %c0_50 = arith.constant 0 : index
    %c0_51 = arith.constant 0 : index
    %94 = vector.load %arg13[%c2_49, %c0_50, %c0_51] : memref<15x15x128xf32, #tpu.memory_space<vmem>>, vector<3x15x128xf32>
    %cst_52 = arith.constant dense<0xFF800000> : vector<15x128xf32>
    %95 = vector.multi_reduction <maximumf>, %94, %cst_52 [0] : vector<3x15x128xf32> to vector<15x128xf32>
    %96 = vector.extract_strided_slice %95 {offsets = [0, 0], sizes = [3, 128], strides = [1, 1]} : vector<15x128xf32> to vector<3x128xf32>
    %cst_53 = arith.constant dense<0xFF800000> : vector<128xf32>
    %97 = vector.multi_reduction <maximumf>, %96, %cst_53 [0] : vector<3x128xf32> to vector<128xf32>
    %98 = vector.shape_cast %97 : vector<128xf32> to vector<1x128xf32>
    %99 = arith.addf %93, %98 : vector<1x128xf32>
    %100 = vector.extract_strided_slice %95 {offsets = [2, 0], sizes = [3, 128], strides = [1, 1]} : vector<15x128xf32> to vector<3x128xf32>
    %cst_54 = arith.constant dense<0xFF800000> : vector<128xf32>
    %101 = vector.multi_reduction <maximumf>, %100, %cst_54 [0] : vector<3x128xf32> to vector<128xf32>
    %102 = vector.shape_cast %101 : vector<128xf32> to vector<1x128xf32>
    %103 = arith.addf %99, %102 : vector<1x128xf32>
    %104 = vector.extract_strided_slice %95 {offsets = [4, 0], sizes = [3, 128], strides = [1, 1]} : vector<15x128xf32> to vector<3x128xf32>
    %cst_55 = arith.constant dense<0xFF800000> : vector<128xf32>
    %105 = vector.multi_reduction <maximumf>, %104, %cst_55 [0] : vector<3x128xf32> to vector<128xf32>
    %106 = vector.shape_cast %105 : vector<128xf32> to vector<1x128xf32>
    %107 = arith.addf %103, %106 : vector<1x128xf32>
    %108 = vector.extract_strided_slice %95 {offsets = [6, 0], sizes = [3, 128], strides = [1, 1]} : vector<15x128xf32> to vector<3x128xf32>
    %cst_56 = arith.constant dense<0xFF800000> : vector<128xf32>
    %109 = vector.multi_reduction <maximumf>, %108, %cst_56 [0] : vector<3x128xf32> to vector<128xf32>
    %110 = vector.shape_cast %109 : vector<128xf32> to vector<1x128xf32>
    %111 = arith.addf %107, %110 : vector<1x128xf32>
    %112 = vector.extract_strided_slice %95 {offsets = [8, 0], sizes = [3, 128], strides = [1, 1]} : vector<15x128xf32> to vector<3x128xf32>
    %cst_57 = arith.constant dense<0xFF800000> : vector<128xf32>
    %113 = vector.multi_reduction <maximumf>, %112, %cst_57 [0] : vector<3x128xf32> to vector<128xf32>
    %114 = vector.shape_cast %113 : vector<128xf32> to vector<1x128xf32>
    %115 = arith.addf %111, %114 : vector<1x128xf32>
    %116 = vector.extract_strided_slice %95 {offsets = [10, 0], sizes = [3, 128], strides = [1, 1]} : vector<15x128xf32> to vector<3x128xf32>
    %cst_58 = arith.constant dense<0xFF800000> : vector<128xf32>
    %117 = vector.multi_reduction <maximumf>, %116, %cst_58 [0] : vector<3x128xf32> to vector<128xf32>
    %118 = vector.shape_cast %117 : vector<128xf32> to vector<1x128xf32>
    %119 = arith.addf %115, %118 : vector<1x128xf32>
    %120 = vector.extract_strided_slice %95 {offsets = [12, 0], sizes = [3, 128], strides = [1, 1]} : vector<15x128xf32> to vector<3x128xf32>
    %cst_59 = arith.constant dense<0xFF800000> : vector<128xf32>
    %121 = vector.multi_reduction <maximumf>, %120, %cst_59 [0] : vector<3x128xf32> to vector<128xf32>
    %122 = vector.shape_cast %121 : vector<128xf32> to vector<1x128xf32>
    %123 = arith.addf %119, %122 : vector<1x128xf32>
    %c4_60 = arith.constant 4 : index
    %c0_61 = arith.constant 0 : index
    %c0_62 = arith.constant 0 : index
    %124 = vector.load %arg13[%c4_60, %c0_61, %c0_62] : memref<15x15x128xf32, #tpu.memory_space<vmem>>, vector<3x15x128xf32>
    %cst_63 = arith.constant dense<0xFF800000> : vector<15x128xf32>
    %125 = vector.multi_reduction <maximumf>, %124, %cst_63 [0] : vector<3x15x128xf32> to vector<15x128xf32>
    %126 = vector.extract_strided_slice %125 {offsets = [0, 0], sizes = [3, 128], strides = [1, 1]} : vector<15x128xf32> to vector<3x128xf32>
    %cst_64 = arith.constant dense<0xFF800000> : vector<128xf32>
    %127 = vector.multi_reduction <maximumf>, %126, %cst_64 [0] : vector<3x128xf32> to vector<128xf32>
    %128 = vector.shape_cast %127 : vector<128xf32> to vector<1x128xf32>
    %129 = arith.addf %123, %128 : vector<1x128xf32>
    %130 = vector.extract_strided_slice %125 {offsets = [2, 0], sizes = [3, 128], strides = [1, 1]} : vector<15x128xf32> to vector<3x128xf32>
    %cst_65 = arith.constant dense<0xFF800000> : vector<128xf32>
    %131 = vector.multi_reduction <maximumf>, %130, %cst_65 [0] : vector<3x128xf32> to vector<128xf32>
    %132 = vector.shape_cast %131 : vector<128xf32> to vector<1x128xf32>
    %133 = arith.addf %129, %132 : vector<1x128xf32>
    %134 = vector.extract_strided_slice %125 {offsets = [4, 0], sizes = [3, 128], strides = [1, 1]} : vector<15x128xf32> to vector<3x128xf32>
    %cst_66 = arith.constant dense<0xFF800000> : vector<128xf32>
    %135 = vector.multi_reduction <maximumf>, %134, %cst_66 [0] : vector<3x128xf32> to vector<128xf32>
    %136 = vector.shape_cast %135 : vector<128xf32> to vector<1x128xf32>
    %137 = arith.addf %133, %136 : vector<1x128xf32>
    %138 = vector.extract_strided_slice %125 {offsets = [6, 0], sizes = [3, 128], strides = [1, 1]} : vector<15x128xf32> to vector<3x128xf32>
    %cst_67 = arith.constant dense<0xFF800000> : vector<128xf32>
    %139 = vector.multi_reduction <maximumf>, %138, %cst_67 [0] : vector<3x128xf32> to vector<128xf32>
    %140 = vector.shape_cast %139 : vector<128xf32> to vector<1x128xf32>
    %141 = arith.addf %137, %140 : vector<1x128xf32>
    %142 = vector.extract_strided_slice %125 {offsets = [8, 0], sizes = [3, 128], strides = [1, 1]} : vector<15x128xf32> to vector<3x128xf32>
    %cst_68 = arith.constant dense<0xFF800000> : vector<128xf32>
    %143 = vector.multi_reduction <maximumf>, %142, %cst_68 [0] : vector<3x128xf32> to vector<128xf32>
    %144 = vector.shape_cast %143 : vector<128xf32> to vector<1x128xf32>
    %145 = arith.addf %141, %144 : vector<1x128xf32>
    %146 = vector.extract_strided_slice %125 {offsets = [10, 0], sizes = [3, 128], strides = [1, 1]} : vector<15x128xf32> to vector<3x128xf32>
    %cst_69 = arith.constant dense<0xFF800000> : vector<128xf32>
    %147 = vector.multi_reduction <maximumf>, %146, %cst_69 [0] : vector<3x128xf32> to vector<128xf32>
    %148 = vector.shape_cast %147 : vector<128xf32> to vector<1x128xf32>
    %149 = arith.addf %145, %148 : vector<1x128xf32>
    %150 = vector.extract_strided_slice %125 {offsets = [12, 0], sizes = [3, 128], strides = [1, 1]} : vector<15x128xf32> to vector<3x128xf32>
    %cst_70 = arith.constant dense<0xFF800000> : vector<128xf32>
    %151 = vector.multi_reduction <maximumf>, %150, %cst_70 [0] : vector<3x128xf32> to vector<128xf32>
    %152 = vector.shape_cast %151 : vector<128xf32> to vector<1x128xf32>
    %153 = arith.addf %149, %152 : vector<1x128xf32>
    %c6_71 = arith.constant 6 : index
    %c0_72 = arith.constant 0 : index
    %c0_73 = arith.constant 0 : index
    %154 = vector.load %arg13[%c6_71, %c0_72, %c0_73] : memref<15x15x128xf32, #tpu.memory_space<vmem>>, vector<3x15x128xf32>
    %cst_74 = arith.constant dense<0xFF800000> : vector<15x128xf32>
    %155 = vector.multi_reduction <maximumf>, %154, %cst_74 [0] : vector<3x15x128xf32> to vector<15x128xf32>
    %156 = vector.extract_strided_slice %155 {offsets = [0, 0], sizes = [3, 128], strides = [1, 1]} : vector<15x128xf32> to vector<3x128xf32>
    %cst_75 = arith.constant dense<0xFF800000> : vector<128xf32>
    %157 = vector.multi_reduction <maximumf>, %156, %cst_75 [0] : vector<3x128xf32> to vector<128xf32>
    %158 = vector.shape_cast %157 : vector<128xf32> to vector<1x128xf32>
    %159 = arith.addf %153, %158 : vector<1x128xf32>
    %160 = vector.extract_strided_slice %155 {offsets = [2, 0], sizes = [3, 128], strides = [1, 1]} : vector<15x128xf32> to vector<3x128xf32>
    %cst_76 = arith.constant dense<0xFF800000> : vector<128xf32>
    %161 = vector.multi_reduction <maximumf>, %160, %cst_76 [0] : vector<3x128xf32> to vector<128xf32>
    %162 = vector.shape_cast %161 : vector<128xf32> to vector<1x128xf32>
    %163 = arith.addf %159, %162 : vector<1x128xf32>
    %164 = vector.extract_strided_slice %155 {offsets = [4, 0], sizes = [3, 128], strides = [1, 1]} : vector<15x128xf32> to vector<3x128xf32>
    %cst_77 = arith.constant dense<0xFF800000> : vector<128xf32>
    %165 = vector.multi_reduction <maximumf>, %164, %cst_77 [0] : vector<3x128xf32> to vector<128xf32>
    %166 = vector.shape_cast %165 : vector<128xf32> to vector<1x128xf32>
    %167 = arith.addf %163, %166 : vector<1x128xf32>
    %168 = vector.extract_strided_slice %155 {offsets = [6, 0], sizes = [3, 128], strides = [1, 1]} : vector<15x128xf32> to vector<3x128xf32>
    %cst_78 = arith.constant dense<0xFF800000> : vector<128xf32>
    %169 = vector.multi_reduction <maximumf>, %168, %cst_78 [0] : vector<3x128xf32> to vector<128xf32>
    %170 = vector.shape_cast %169 : vector<128xf32> to vector<1x128xf32>
    %171 = arith.addf %167, %170 : vector<1x128xf32>
    %172 = vector.extract_strided_slice %155 {offsets = [8, 0], sizes = [3, 128], strides = [1, 1]} : vector<15x128xf32> to vector<3x128xf32>
    %cst_79 = arith.constant dense<0xFF800000> : vector<128xf32>
    %173 = vector.multi_reduction <maximumf>, %172, %cst_79 [0] : vector<3x128xf32> to vector<128xf32>
    %174 = vector.shape_cast %173 : vector<128xf32> to vector<1x128xf32>
    %175 = arith.addf %171, %174 : vector<1x128xf32>
    %176 = vector.extract_strided_slice %155 {offsets = [10, 0], sizes = [3, 128], strides = [1, 1]} : vector<15x128xf32> to vector<3x128xf32>
    %cst_80 = arith.constant dense<0xFF800000> : vector<128xf32>
    %177 = vector.multi_reduction <maximumf>, %176, %cst_80 [0] : vector<3x128xf32> to vector<128xf32>
    %178 = vector.shape_cast %177 : vector<128xf32> to vector<1x128xf32>
    %179 = arith.addf %175, %178 : vector<1x128xf32>
    %180 = vector.extract_strided_slice %155 {offsets = [12, 0], sizes = [3, 128], strides = [1, 1]} : vector<15x128xf32> to vector<3x128xf32>
    %cst_81 = arith.constant dense<0xFF800000> : vector<128xf32>
    %181 = vector.multi_reduction <maximumf>, %180, %cst_81 [0] : vector<3x128xf32> to vector<128xf32>
    %182 = vector.shape_cast %181 : vector<128xf32> to vector<1x128xf32>
    %183 = arith.addf %179, %182 : vector<1x128xf32>
    %c8_82 = arith.constant 8 : index
    %c0_83 = arith.constant 0 : index
    %c0_84 = arith.constant 0 : index
    %184 = vector.load %arg13[%c8_82, %c0_83, %c0_84] : memref<15x15x128xf32, #tpu.memory_space<vmem>>, vector<3x15x128xf32>
    %cst_85 = arith.constant dense<0xFF800000> : vector<15x128xf32>
    %185 = vector.multi_reduction <maximumf>, %184, %cst_85 [0] : vector<3x15x128xf32> to vector<15x128xf32>
    %186 = vector.extract_strided_slice %185 {offsets = [0, 0], sizes = [3, 128], strides = [1, 1]} : vector<15x128xf32> to vector<3x128xf32>
    %cst_86 = arith.constant dense<0xFF800000> : vector<128xf32>
    %187 = vector.multi_reduction <maximumf>, %186, %cst_86 [0] : vector<3x128xf32> to vector<128xf32>
    %188 = vector.shape_cast %187 : vector<128xf32> to vector<1x128xf32>
    %189 = arith.addf %183, %188 : vector<1x128xf32>
    %190 = vector.extract_strided_slice %185 {offsets = [2, 0], sizes = [3, 128], strides = [1, 1]} : vector<15x128xf32> to vector<3x128xf32>
    %cst_87 = arith.constant dense<0xFF800000> : vector<128xf32>
    %191 = vector.multi_reduction <maximumf>, %190, %cst_87 [0] : vector<3x128xf32> to vector<128xf32>
    %192 = vector.shape_cast %191 : vector<128xf32> to vector<1x128xf32>
    %193 = arith.addf %189, %192 : vector<1x128xf32>
    %194 = vector.extract_strided_slice %185 {offsets = [4, 0], sizes = [3, 128], strides = [1, 1]} : vector<15x128xf32> to vector<3x128xf32>
    %cst_88 = arith.constant dense<0xFF800000> : vector<128xf32>
    %195 = vector.multi_reduction <maximumf>, %194, %cst_88 [0] : vector<3x128xf32> to vector<128xf32>
    %196 = vector.shape_cast %195 : vector<128xf32> to vector<1x128xf32>
    %197 = arith.addf %193, %196 : vector<1x128xf32>
    %198 = vector.extract_strided_slice %185 {offsets = [6, 0], sizes = [3, 128], strides = [1, 1]} : vector<15x128xf32> to vector<3x128xf32>
    %cst_89 = arith.constant dense<0xFF800000> : vector<128xf32>
    %199 = vector.multi_reduction <maximumf>, %198, %cst_89 [0] : vector<3x128xf32> to vector<128xf32>
    %200 = vector.shape_cast %199 : vector<128xf32> to vector<1x128xf32>
    %201 = arith.addf %197, %200 : vector<1x128xf32>
    %202 = vector.extract_strided_slice %185 {offsets = [8, 0], sizes = [3, 128], strides = [1, 1]} : vector<15x128xf32> to vector<3x128xf32>
    %cst_90 = arith.constant dense<0xFF800000> : vector<128xf32>
    %203 = vector.multi_reduction <maximumf>, %202, %cst_90 [0] : vector<3x128xf32> to vector<128xf32>
    %204 = vector.shape_cast %203 : vector<128xf32> to vector<1x128xf32>
    %205 = arith.addf %201, %204 : vector<1x128xf32>
    %206 = vector.extract_strided_slice %185 {offsets = [10, 0], sizes = [3, 128], strides = [1, 1]} : vector<15x128xf32> to vector<3x128xf32>
    %cst_91 = arith.constant dense<0xFF800000> : vector<128xf32>
    %207 = vector.multi_reduction <maximumf>, %206, %cst_91 [0] : vector<3x128xf32> to vector<128xf32>
    %208 = vector.shape_cast %207 : vector<128xf32> to vector<1x128xf32>
    %209 = arith.addf %205, %208 : vector<1x128xf32>
    %210 = vector.extract_strided_slice %185 {offsets = [12, 0], sizes = [3, 128], strides = [1, 1]} : vector<15x128xf32> to vector<3x128xf32>
    %cst_92 = arith.constant dense<0xFF800000> : vector<128xf32>
    %211 = vector.multi_reduction <maximumf>, %210, %cst_92 [0] : vector<3x128xf32> to vector<128xf32>
    %212 = vector.shape_cast %211 : vector<128xf32> to vector<1x128xf32>
    %213 = arith.addf %209, %212 : vector<1x128xf32>
    %c10_93 = arith.constant 10 : index
    %c0_94 = arith.constant 0 : index
    %c0_95 = arith.constant 0 : index
    %214 = vector.load %arg13[%c10_93, %c0_94, %c0_95] : memref<15x15x128xf32, #tpu.memory_space<vmem>>, vector<3x15x128xf32>
    %cst_96 = arith.constant dense<0xFF800000> : vector<15x128xf32>
    %215 = vector.multi_reduction <maximumf>, %214, %cst_96 [0] : vector<3x15x128xf32> to vector<15x128xf32>
    %216 = vector.extract_strided_slice %215 {offsets = [0, 0], sizes = [3, 128], strides = [1, 1]} : vector<15x128xf32> to vector<3x128xf32>
    %cst_97 = arith.constant dense<0xFF800000> : vector<128xf32>
    %217 = vector.multi_reduction <maximumf>, %216, %cst_97 [0] : vector<3x128xf32> to vector<128xf32>
    %218 = vector.shape_cast %217 : vector<128xf32> to vector<1x128xf32>
    %219 = arith.addf %213, %218 : vector<1x128xf32>
    %220 = vector.extract_strided_slice %215 {offsets = [2, 0], sizes = [3, 128], strides = [1, 1]} : vector<15x128xf32> to vector<3x128xf32>
    %cst_98 = arith.constant dense<0xFF800000> : vector<128xf32>
    %221 = vector.multi_reduction <maximumf>, %220, %cst_98 [0] : vector<3x128xf32> to vector<128xf32>
    %222 = vector.shape_cast %221 : vector<128xf32> to vector<1x128xf32>
    %223 = arith.addf %219, %222 : vector<1x128xf32>
    %224 = vector.extract_strided_slice %215 {offsets = [4, 0], sizes = [3, 128], strides = [1, 1]} : vector<15x128xf32> to vector<3x128xf32>
    %cst_99 = arith.constant dense<0xFF800000> : vector<128xf32>
    %225 = vector.multi_reduction <maximumf>, %224, %cst_99 [0] : vector<3x128xf32> to vector<128xf32>
    %226 = vector.shape_cast %225 : vector<128xf32> to vector<1x128xf32>
    %227 = arith.addf %223, %226 : vector<1x128xf32>
    %228 = vector.extract_strided_slice %215 {offsets = [6, 0], sizes = [3, 128], strides = [1, 1]} : vector<15x128xf32> to vector<3x128xf32>
    %cst_100 = arith.constant dense<0xFF800000> : vector<128xf32>
    %229 = vector.multi_reduction <maximumf>, %228, %cst_100 [0] : vector<3x128xf32> to vector<128xf32>
    %230 = vector.shape_cast %229 : vector<128xf32> to vector<1x128xf32>
    %231 = arith.addf %227, %230 : vector<1x128xf32>
    %232 = vector.extract_strided_slice %215 {offsets = [8, 0], sizes = [3, 128], strides = [1, 1]} : vector<15x128xf32> to vector<3x128xf32>
    %cst_101 = arith.constant dense<0xFF800000> : vector<128xf32>
    %233 = vector.multi_reduction <maximumf>, %232, %cst_101 [0] : vector<3x128xf32> to vector<128xf32>
    %234 = vector.shape_cast %233 : vector<128xf32> to vector<1x128xf32>
    %235 = arith.addf %231, %234 : vector<1x128xf32>
    %236 = vector.extract_strided_slice %215 {offsets = [10, 0], sizes = [3, 128], strides = [1, 1]} : vector<15x128xf32> to vector<3x128xf32>
    %cst_102 = arith.constant dense<0xFF800000> : vector<128xf32>
    %237 = vector.multi_reduction <maximumf>, %236, %cst_102 [0] : vector<3x128xf32> to vector<128xf32>
    %238 = vector.shape_cast %237 : vector<128xf32> to vector<1x128xf32>
    %239 = arith.addf %235, %238 : vector<1x128xf32>
    %240 = vector.extract_strided_slice %215 {offsets = [12, 0], sizes = [3, 128], strides = [1, 1]} : vector<15x128xf32> to vector<3x128xf32>
    %cst_103 = arith.constant dense<0xFF800000> : vector<128xf32>
    %241 = vector.multi_reduction <maximumf>, %240, %cst_103 [0] : vector<3x128xf32> to vector<128xf32>
    %242 = vector.shape_cast %241 : vector<128xf32> to vector<1x128xf32>
    %243 = arith.addf %239, %242 : vector<1x128xf32>
    %c12_104 = arith.constant 12 : index
    %c0_105 = arith.constant 0 : index
    %c0_106 = arith.constant 0 : index
    %244 = vector.load %arg13[%c12_104, %c0_105, %c0_106] : memref<15x15x128xf32, #tpu.memory_space<vmem>>, vector<3x15x128xf32>
    %cst_107 = arith.constant dense<0xFF800000> : vector<15x128xf32>
    %245 = vector.multi_reduction <maximumf>, %244, %cst_107 [0] : vector<3x15x128xf32> to vector<15x128xf32>
    %246 = vector.extract_strided_slice %245 {offsets = [0, 0], sizes = [3, 128], strides = [1, 1]} : vector<15x128xf32> to vector<3x128xf32>
    %cst_108 = arith.constant dense<0xFF800000> : vector<128xf32>
    %247 = vector.multi_reduction <maximumf>, %246, %cst_108 [0] : vector<3x128xf32> to vector<128xf32>
    %248 = vector.shape_cast %247 : vector<128xf32> to vector<1x128xf32>
    %249 = arith.addf %243, %248 : vector<1x128xf32>
    %250 = vector.extract_strided_slice %245 {offsets = [2, 0], sizes = [3, 128], strides = [1, 1]} : vector<15x128xf32> to vector<3x128xf32>
    %cst_109 = arith.constant dense<0xFF800000> : vector<128xf32>
    %251 = vector.multi_reduction <maximumf>, %250, %cst_109 [0] : vector<3x128xf32> to vector<128xf32>
    %252 = vector.shape_cast %251 : vector<128xf32> to vector<1x128xf32>
    %253 = arith.addf %249, %252 : vector<1x128xf32>
    %254 = vector.extract_strided_slice %245 {offsets = [4, 0], sizes = [3, 128], strides = [1, 1]} : vector<15x128xf32> to vector<3x128xf32>
    %cst_110 = arith.constant dense<0xFF800000> : vector<128xf32>
    %255 = vector.multi_reduction <maximumf>, %254, %cst_110 [0] : vector<3x128xf32> to vector<128xf32>
    %256 = vector.shape_cast %255 : vector<128xf32> to vector<1x128xf32>
    %257 = arith.addf %253, %256 : vector<1x128xf32>
    %258 = vector.extract_strided_slice %245 {offsets = [6, 0], sizes = [3, 128], strides = [1, 1]} : vector<15x128xf32> to vector<3x128xf32>
    %cst_111 = arith.constant dense<0xFF800000> : vector<128xf32>
    %259 = vector.multi_reduction <maximumf>, %258, %cst_111 [0] : vector<3x128xf32> to vector<128xf32>
    %260 = vector.shape_cast %259 : vector<128xf32> to vector<1x128xf32>
    %261 = arith.addf %257, %260 : vector<1x128xf32>
    %262 = vector.extract_strided_slice %245 {offsets = [8, 0], sizes = [3, 128], strides = [1, 1]} : vector<15x128xf32> to vector<3x128xf32>
    %cst_112 = arith.constant dense<0xFF800000> : vector<128xf32>
    %263 = vector.multi_reduction <maximumf>, %262, %cst_112 [0] : vector<3x128xf32> to vector<128xf32>
    %264 = vector.shape_cast %263 : vector<128xf32> to vector<1x128xf32>
    %265 = arith.addf %261, %264 : vector<1x128xf32>
    %266 = vector.extract_strided_slice %245 {offsets = [10, 0], sizes = [3, 128], strides = [1, 1]} : vector<15x128xf32> to vector<3x128xf32>
    %cst_113 = arith.constant dense<0xFF800000> : vector<128xf32>
    %267 = vector.multi_reduction <maximumf>, %266, %cst_113 [0] : vector<3x128xf32> to vector<128xf32>
    %268 = vector.shape_cast %267 : vector<128xf32> to vector<1x128xf32>
    %269 = arith.addf %265, %268 : vector<1x128xf32>
    %270 = vector.extract_strided_slice %245 {offsets = [12, 0], sizes = [3, 128], strides = [1, 1]} : vector<15x128xf32> to vector<3x128xf32>
    %cst_114 = arith.constant dense<0xFF800000> : vector<128xf32>
    %271 = vector.multi_reduction <maximumf>, %270, %cst_114 [0] : vector<3x128xf32> to vector<128xf32>
    %272 = vector.shape_cast %271 : vector<128xf32> to vector<1x128xf32>
    %273 = arith.addf %269, %272 : vector<1x128xf32>
    %cst_115 = arith.constant 0.0204081628 : f32
    %274 = vector.broadcast %cst_115 : f32 to vector<1x128xf32>
    %275 = arith.mulf %273, %274 : vector<1x128xf32>
    %c0_116 = arith.constant 0 : index
    %c0_117 = arith.constant 0 : index
    %276 = vector.load %arg5[%c0_116, %c0_117] : memref<128x6xf32, #tpu.memory_space<vmem>>, vector<128x6xf32>
    %cst_118 = arith.constant dense<0.000000e+00> : vector<1x6xf32>
    %277 = tpu.matmul %275, %276, %cst_118 {dimension_numbers = #tpu.dot_dimension_numbers<[1], [0], [0], [1], [0, 0, 1, 1], [], []>} : vector<1x128xf32>, vector<128x6xf32>, vector<1x6xf32> -> vector<1x6xf32>
    %c0_119 = arith.constant 0 : index
    %c0_120 = arith.constant 0 : index
    %278 = vector.load %arg6[%c0_119, %c0_120] : memref<1x6xf32, #tpu.memory_space<vmem>>, vector<1x6xf32>
    %279 = arith.addf %277, %278 : vector<1x6xf32>
    %cst_121 = arith.constant 0.000000e+00 : f32
    %280 = vector.broadcast %cst_121 : f32 to vector<1x6xf32>
    %281 = arith.maximumf %279, %280 : vector<1x6xf32>
    %c0_122 = arith.constant 0 : index
    %c0_123 = arith.constant 0 : index
    %c0_124 = arith.constant 0 : index
    %282 = vector.load %arg2[%c0_122, %c0_123, %c0_124] : memref<1x1x4xf32, #tpu.memory_space<vmem>>, vector<1x1x4xf32>
    %283 = vector.shape_cast %282 : vector<1x1x4xf32> to vector<1x4xf32>
    %c0_125 = arith.constant 0 : index
    %c0_126 = arith.constant 0 : index
    %284 = vector.load %arg7[%c0_125, %c0_126] : memref<4x2xf32, #tpu.memory_space<vmem>>, vector<4x2xf32>
    %cst_127 = arith.constant dense<0.000000e+00> : vector<1x2xf32>
    %285 = tpu.matmul %283, %284, %cst_127 {dimension_numbers = #tpu.dot_dimension_numbers<[1], [0], [0], [1], [0, 0, 1, 1], [], []>} : vector<1x4xf32>, vector<4x2xf32>, vector<1x2xf32> -> vector<1x2xf32>
    %c0_128 = arith.constant 0 : index
    %c0_129 = arith.constant 0 : index
    %286 = vector.load %arg8[%c0_128, %c0_129] : memref<1x2xf32, #tpu.memory_space<vmem>>, vector<1x2xf32>
    %287 = arith.addf %285, %286 : vector<1x2xf32>
    %cst_130 = arith.constant 0.000000e+00 : f32
    %288 = vector.broadcast %cst_130 : f32 to vector<1x2xf32>
    %289 = arith.maximumf %287, %288 : vector<1x2xf32>
    %c0_131 = arith.constant 0 : index
    %c0_132 = arith.constant 0 : index
    %290 = vector.load %arg9[%c0_131, %c0_132] : memref<6x2xf32, #tpu.memory_space<vmem>>, vector<6x2xf32>
    %cst_133 = arith.constant dense<0.000000e+00> : vector<1x2xf32>
    %291 = tpu.matmul %281, %290, %cst_133 {dimension_numbers = #tpu.dot_dimension_numbers<[1], [0], [0], [1], [0, 0, 1, 1], [], []>} : vector<1x6xf32>, vector<6x2xf32>, vector<1x2xf32> -> vector<1x2xf32>
    %c0_134 = arith.constant 0 : index
    %c0_135 = arith.constant 0 : index
    %292 = vector.load %arg10[%c0_134, %c0_135] : memref<2x2xf32, #tpu.memory_space<vmem>>, vector<2x2xf32>
    %cst_136 = arith.constant dense<0.000000e+00> : vector<1x2xf32>
    %293 = tpu.matmul %289, %292, %cst_136 {dimension_numbers = #tpu.dot_dimension_numbers<[1], [0], [0], [1], [0, 0, 1, 1], [], []>} : vector<1x2xf32>, vector<2x2xf32>, vector<1x2xf32> -> vector<1x2xf32>
    %294 = arith.addf %291, %293 : vector<1x2xf32>
    %c0_137 = arith.constant 0 : index
    %c0_138 = arith.constant 0 : index
    %295 = vector.load %arg11[%c0_137, %c0_138] : memref<1x2xf32, #tpu.memory_space<vmem>>, vector<1x2xf32>
    %296 = arith.addf %294, %295 : vector<1x2xf32>
    %c0_139 = arith.constant 0 : index
    %c0_140 = arith.constant 0 : index
    %c0_141 = arith.constant 0 : index
    %297 = vector.load %arg12[%c0_139, %c0_140, %c0_141] : memref<1x1x2xf32, #tpu.memory_space<vmem>>, vector<1x1x2xf32>
    %298 = vector.shape_cast %297 : vector<1x1x2xf32> to vector<1x2xf32>
    %299 = vector.shape_cast %296 : vector<1x2xf32> to vector<1x1x2xf32>
    tpu.vector_store %arg12[%c0_139, %c0_140, %c0_141], %299 {strides = array<i32>} : memref<1x1x2xf32, #tpu.memory_space<vmem>>, vector<1x1x2xf32>,
    return
  }
  func.func @transform_0(%arg0: i32) -> (i32, i32, i32) {
    %c0_i32 = arith.constant 0 : i32
    %c0_i32_0 = arith.constant 0 : i32
    %c0_i32_1 = arith.constant 0 : i32
    return %arg0, %c0_i32, %c0_i32_0 : i32, i32, i32
  }
  func.func @transform_1(%arg0: i32) -> (i32, i32, i32) {
    %c0_i32 = arith.constant 0 : i32
    %c0_i32_0 = arith.constant 0 : i32
    %c0_i32_1 = arith.constant 0 : i32
    return %arg0, %c0_i32, %c0_i32_0 : i32, i32, i32
  }
  func.func @transform_2(%arg0: i32) -> (i32, i32) {
    %c0_i32 = arith.constant 0 : i32
    %c0_i32_0 = arith.constant 0 : i32
    %c0_i32_1 = arith.constant 0 : i32
    return %c0_i32, %c0_i32_0 : i32, i32
  }
  func.func @transform_3(%arg0: i32) -> (i32, i32) {
    %c0_i32 = arith.constant 0 : i32
    %c0_i32_0 = arith.constant 0 : i32
    %c0_i32_1 = arith.constant 0 : i32
    return %c0_i32, %c0_i32_0 : i32, i32
  }
  func.func @transform_4(%arg0: i32) -> (i32, i32) {
    %c0_i32 = arith.constant 0 : i32
    %c0_i32_0 = arith.constant 0 : i32
    %c0_i32_1 = arith.constant 0 : i32
    return %c0_i32, %c0_i32_0 : i32, i32
  }
  func.func @transform_5(%arg0: i32) -> (i32, i32) {
    %c0_i32 = arith.constant 0 : i32
    %c0_i32_0 = arith.constant 0 : i32
    %c0_i32_1 = arith.constant 0 : i32
    return %c0_i32, %c0_i32_0 : i32, i32
  }
  func.func @transform_6(%arg0: i32) -> (i32, i32) {
    %c0_i32 = arith.constant 0 : i32
    %c0_i32_0 = arith.constant 0 : i32
    %c0_i32_1 = arith.constant 0 : i32
    return %c0_i32, %c0_i32_0 : i32, i32
  }
  func.func @transform_7(%arg0: i32) -> (i32, i32) {
    %c0_i32 = arith.constant 0 : i32
    %c0_i32_0 = arith.constant 0 : i32
    %c0_i32_1 = arith.constant 0 : i32
    return %c0_i32, %c0_i32_0 : i32, i32
  }
  func.func @transform_8(%arg0: i32) -> (i32, i32) {
    %c0_i32 = arith.constant 0 : i32
    %c0_i32_0 = arith.constant 0 : i32
    %c0_i32_1 = arith.constant 0 : i32
    return %c0_i32, %c0_i32_0 : i32, i32
  }
  func.func @transform_9(%arg0: i32) -> (i32, i32) {
    %c0_i32 = arith.constant 0 : i32
    %c0_i32_0 = arith.constant 0 : i32
    %c0_i32_1 = arith.constant 0 : i32
    return %c0_i32, %c0_i32_0 : i32, i32
  }
  func.func @transform_10(%arg0: i32) -> (i32, i32) {
    %c0_i32 = arith.constant 0 : i32
    %c0_i32_0 = arith.constant 0 : i32
    %c0_i32_1 = arith.constant 0 : i32
    return %c0_i32, %c0_i32_0 : i32, i32
  }
  func.func @transform_11(%arg0: i32) -> (i32, i32, i32) {
    %c0_i32 = arith.constant 0 : i32
    %c0_i32_0 = arith.constant 0 : i32
    %c0_i32_1 = arith.constant 0 : i32
    return %arg0, %c0_i32, %c0_i32_0 : i32, i32, i32
  }
}

</mosaic_0001>

<bundles_post_ra>
// kernel: image_date_regression_forward.1
= control target key start
LH: loop header
LB: loop body
LE: loop exit
PB: predicated region body
PF: predicated region fallthrough
CT: control target
= control target key end

     0   :  { %s2691_s0 = inlined_call_operand.vmem [shape: f32[2,176,147], index: 0, kind: input, shape index: {}]   ;;  %s2692_s1 = inlined_call_operand.vmem [shape: f32[2,1,4], index: 1, kind: input, shape index: {}]   ;;  %s2693_s2 = inlined_call_operand.vmem [shape: f32[147,128], index: 2, kind: input, shape index: {}]   ;;  %s2694_s3 = inlined_call_operand.vmem [shape: f32[1,128], index: 3, kind: input, shape index: {}]   ;;  %s2695_s4 = inlined_call_operand.vmem [shape: f32[128,6], index: 4, kind: input, shape index: {}]   ;;  %s2696_s5 = inlined_call_operand.vmem [shape: f32[1,6], index: 5, kind: input, shape index: {}]   ;;  %s2697_s6 = inlined_call_operand.vmem [shape: f32[4,2], index: 6, kind: input, shape index: {}]   ;;  %s2698_s7 = inlined_call_operand.vmem [shape: f32[1,2], index: 7, kind: input, shape index: {}]   ;;  %s2699_s8 = inlined_call_operand.vmem [shape: f32[6,2], index: 8, kind: input, shape index: {}]   ;;  %s2700_s9 = inlined_call_operand.vmem [shape: f32[2,2], index: 9, kind: input, shape index: {}]   ;;  %s2701_s10 = inlined_call_operand.vmem [shape: f32[1,2], index: 10, kind: input, shape index: {}]   ;;  %s2702_s11 = inlined_call_operand.hbm [shape: f32[2,1,2], index: 11, kind: output, shape index: {}]  }
   0x1   :  { %2703 = sst [smem:[#allocation6_spill]] %s2691_s0 }
   0x2   :  { %16 = vsyncpa [#allocation4], 0 }
   0x3   :  { %18 = vsyncpa [#allocation4 + $0x1], 0  ;;  %s2078_s17 = smov 0   ;;  %s2080_s18 = smov 0  }
   0x4   :  { %s2082_s19 = smov 0   ;;  %s2084_s20 = smov 0  }
   0x5 LB: > { %s2099_s21 = sadd.s32 4294967295, %s2012_s20   ;;  %s1724_s22 = sadd.s32 4294967294, %s2012_s20   ;;  %s2012_s20 = sphi %s2084_s20, %s2710_s20   ;;  %s2008_s19 = sphi %s2082_s19, %s2709_s19   ;;  %s2004_s18 = sphi %s2080_s18, %s2708_s18   ;;  %s2000_s17 = sphi %s2078_s17, %s2707_s17  }
   0x6   : > { %s2103_s23 = sadd.s32 1, %s2012_s20   ;;  %s272_s24 = sadd.s32 1, %s2008_s19 }
   0x7   : > { %s269_s25 = ssub.s32 %s2012_s20, %s2103_s23  ;;  %p282_p0 = scmp.ne.s32.totalorder %s2008_s19, %s2004_s18 }
   0x8   : > { %p270_p1 = scmp.eq.s32.totalorder %s269_s25, 0  ;;  %p283_p2 = scmp.eq.s32.totalorder %s2099_s21, 1 }
   0x9   : > { %p288_p3 = scmp.ne.s32.totalorder %s2004_s18, %s2000_s17  ;;  %p289_p4 = scmp.eq.s32.totalorder %s1724_s22, 1 }
   0xa   : > { %s2114_s26 = scalar_select %p270_p1, %s2008_s19, %s272_s24  }
   0xb   : > { %p2116_p5 = por %p283_p2, %p282_p0  ;;  %p2120_p6 = por %p289_p4, %p288_p3 }
   0xc   : > { %p1727_p7 = scmp.ge.s32.totalorder %s2012_s20, 1  ;;  %p348_p8 = scmp.lt.s32.totalorder %s2012_s20, 3 }
   0xe   : > { %p349_p9 = pnand %p1727_p7, %p348_p8 }
   0xf   : > { %v442_v0 = vld [vmem:[%s2693_s2] sm:$0xff] (!%p349_p9)  ;;  %v443_v1 = vld [vmem:[%s2693_s2 + $0x8] sm:$0xff] (!%p349_p9)  ;;  %v444_v2 = vld [vmem:[%s2693_s2 + $0x10] sm:$0xff] (!%p349_p9)  ;;  %v2014_v3 = vmov (!%p349_p9), 0.0|0.0   ;;  %v2015_v6 = vmov (!%p349_p9), 0.0   ;;  %p390_p10 = scmp.lt.s32.totalorder (!%p349_p9), %s2099_s21, 1 }
  0x10   : > { %352 = sbr.rel (%p349_p9) target bundleno = 885 (0x375), region = 64  ;;  %1835 = vmatprep.subr.bf16.mxu0 (!%p349_p9), %v2014_v3  ;;  %v1836_v4 = vpack.c.bf16 (!%p349_p9), %v443_v1, %v442_v0  ;;  %v445_v5 = vld [vmem:[%s2693_s2 + $0x18] sm:$0xff] (!%p349_p9)  ;;  %1886 = vmatprep.subr.bf16.mxu1 (!%p349_p9), %v2014_v3  ;;  %736 = vst [vmem:[#allocation2] sm:$0xff] (!%p349_p9), %v2015_v6  ;;  %737 = vst [vmem:[#allocation2 + $0x8] sm:$0x7f] (!%p349_p9), %v2015_v6  ;;  %v446_v8 = vld [vmem:[%s2693_s2 + $0x20] sm:$0xff] (!%p349_p9) }
  0x11   : > { %738 = vst [vmem:[#allocation2 + $0x10] sm:$0xff] (!%p349_p9), %v2015_v6  ;;  %739 = vst [vmem:[#allocation2 + $0x18] sm:$0x7f] (!%p349_p9), %v2015_v6  ;;  %v1839_v7 = vpack.c.bf16 (!%p349_p9), %v445_v5, %v444_v2  ;;  %v447_v9 = vld [vmem:[%s2693_s2 + $0x28] sm:$0xff] (!%p349_p9)  ;;  %vm468_vm0 = vcmask (!%p349_p9), 154624   ;;  %s2706_s0 = sld [smem:[#allocation6_spill]] (!%p349_p9) }
  0x12   : > { %740 = vst [vmem:[#allocation2 + $0x20] sm:$0xff] (!%p349_p9), %v2015_v6  ;;  %741 = vst [vmem:[#allocation2 + $0x28] sm:$0x7f] (!%p349_p9), %v2015_v6  ;;  %1837 = vmatpush1.bf16.msra.mxu0 (!%p349_p9), %v1836_v4  ;;  %1896 = vmatpush1.bf16.msra.mxu1 (!%p349_p9), %v1836_v4  ;;  %v1842_v10 = vpack.c.bf16 (!%p349_p9), %v447_v9, %v446_v8  ;;  %v448_v11 = vld [vmem:[%s2693_s2 + $0x30] sm:$0xff] (!%p349_p9)  ;;  %v449_v12 = vld [vmem:[%s2693_s2 + $0x38] sm:$0xff] (!%p349_p9)  ;;  %vm535_vm1 = vcmask (!%p349_p9), 1042432  }
  0x13   : > { %742 = vst [vmem:[#allocation2 + $0x30] sm:$0xff] (!%p349_p9), %v2015_v6  ;;  %743 = vst [vmem:[#allocation2 + $0x38] sm:$0x7f] (!%p349_p9), %v2015_v6  ;;  %1838 = vmatprep.subr.bf16.mxu0 (!%p349_p9), %v2014_v3  ;;  %1887 = vmatprep.subr.bf16.mxu1 (!%p349_p9), %v2014_v3  ;;  %v1845_v14 = vpack.c.bf16 (!%p349_p9), %v449_v12, %v448_v11  ;;  %v450_v15 = vld [vmem:[%s2693_s2 + $0x40] sm:$0xff] (!%p349_p9)  ;;  %v451_v16 = vld [vmem:[%s2693_s2 + $0x48] sm:$0xff] (!%p349_p9)  ;;  %vm2016_vm2 = vmmov (!%p349_p9), 0  }
  0x14   : > { %744 = vst [vmem:[#allocation2 + $0x40] sm:$0xff] (!%p349_p9), %v2015_v6  ;;  %745 = vst [vmem:[#allocation2 + $0x48] sm:$0x7f] (!%p349_p9), %v2015_v6  ;;  %v1848_v18 = vpack.c.bf16 (!%p349_p9), %v451_v16, %v450_v15  ;;  %v452_v19 = vld [vmem:[%s2693_s2 + $0x50] sm:$0xff] (!%p349_p9)  ;;  %v453_v20 = vld [vmem:[%s2693_s2 + $0x58] sm:$0xff] (!%p349_p9)  ;;  %vm834_vm3 = vcmask (!%p349_p9), 1044482  }
  0x15   : > { %746 = vst [vmem:[#allocation2 + $0x50] sm:$0xff] (!%p349_p9), %v2015_v6  ;;  %747 = vst [vmem:[#allocation2 + $0x58] sm:$0x7f] (!%p349_p9), %v2015_v6  ;;  %v1851_v21 = vpack.c.bf16 (!%p349_p9), %v453_v20, %v452_v19  ;;  %v454_v22 = vld [vmem:[%s2693_s2 + $0x60] sm:$0xff] (!%p349_p9)  ;;  %v455_v23 = vld [vmem:[%s2693_s2 + $0x68] sm:$0xff] (!%p349_p9)  ;;  %vm820_vm4 = vcmask (!%p349_p9), 1046528  }
  0x16   : > { %748 = vst [vmem:[#allocation2 + $0x60] sm:$0xff] (!%p349_p9), %v2015_v6  ;;  %749 = vst [vmem:[#allocation2 + $0x68] sm:$0x7f] (!%p349_p9), %v2015_v6  ;;  %1840 = vmatpush1.bf16.msra.mxu0 (!%p349_p9), %v1839_v7  ;;  %1897 = vmatpush1.bf16.msra.mxu1 (!%p349_p9), %v1839_v7  ;;  %v1854_v24 = vpack.c.bf16 (!%p349_p9), %v455_v23, %v454_v22  ;;  %v456_v25 = vld [vmem:[%s2693_s2 + $0x70] sm:$0xff] (!%p349_p9)  ;;  %v457_v26 = vld [vmem:[%s2693_s2 + $0x78] sm:$0xff] (!%p349_p9)  ;;  %vm843_vm5 = vcmask (!%p349_p9), 1046532  }
  0x17   : > { %750 = vst [vmem:[#allocation2 + $0x70] sm:$0xff] %v2015_v6  ;;  %751 = vst [vmem:[#allocation2 + $0x78] sm:$0x7f] %v2015_v6  ;;  %s2171_s24 = scalar_select %p390_p10, %s2099_s21, 1  ;;  %1841 = vmatprep.subr.bf16.mxu0 %v2014_v3  ;;  %1888 = vmatprep.subr.bf16.mxu1 %v2014_v3  ;;  %v1857_v27 = vpack.c.bf16 %v457_v26, %v456_v25  ;;  %v458_v28 = vld [vmem:[%s2693_s2 + $0x80] sm:$0xff]  ;;  %v459_v29 = vld [vmem:[%s2693_s2 + $0x88] sm:$0xff] }
  0x18   : > { %752 = vst [vmem:[#allocation2 + $0x80] sm:$0xff] %v2015_v6  ;;  %753 = vst [vmem:[#allocation2 + $0x88] sm:$0x7f] %v2015_v6  ;;  %v1860_v30 = vpack.c.bf16 %v459_v29, %v458_v28  ;;  %v460_v31 = vld [vmem:[%s2693_s2 + $0x90] sm:$0x7]  ;;  %v1315_v12 = vld [vmem:[%s2695_s4] sm:$0xff] }
  0x19   : > { %754 = vst [vmem:[#allocation2 + $0x90] sm:$0xff] %v2015_v6  ;;  %755 = vst [vmem:[#allocation2 + $0x98] sm:$0x7f] %v2015_v6  ;;  %s1906_s13 = smul.u32 352, %s2171_s24  ;;  %v1318_v16 = vld [vmem:[%s2695_s4 + $0x18] sm:$0xff]  ;;  %v1320_v19 = vld [vmem:[%s2695_s4 + $0x28] sm:$0xff]  ;;  %s397_s12 = scalar_lea.vmem %s2692_s1, %s2171_s24 }
  0x1a   : > { %756 = vst [vmem:[#allocation2 + $0xa0] sm:$0xff] %v2015_v6  ;;  %757 = vst [vmem:[#allocation2 + $0xa8] sm:$0x7f] %v2015_v6  ;;  %1843 = vmatpush1.bf16.msra.mxu0 %v1842_v10  ;;  %1898 = vmatpush1.bf16.msra.mxu1 %v1842_v10  ;;  %v1322_v22 = vld [vmem:[%s2695_s4 + $0x38] sm:$0xff]  ;;  %v1324_v25 = vld [vmem:[%s2695_s4 + $0x48] sm:$0xff]  ;;  %vm852_vm6 = vcmask 1047558  }
  0x1b   : > { %758 = vst [vmem:[#allocation2 + $0xb0] sm:$0xff] %v2015_v6  ;;  %759 = vst [vmem:[#allocation2 + $0xb8] sm:$0x7f] %v2015_v6  ;;  %s2185_s16 = scalar_lea.vmem %s2706_s0, %s1906_s13  ;;  %1844 = vmatprep.subr.bf16.mxu0 %v2014_v3  ;;  %1889 = vmatprep.subr.bf16.mxu1 %v2014_v3  ;;  %v1326_v28 = vld [vmem:[%s2695_s4 + $0x58] sm:$0xff]  ;;  %vm854_vm7 = vcmask 1040384   ;;  %vm1410_vm8 = vcmask 1043456  }
  0x1c   : > { %760 = vst [vmem:[#allocation2 + $0xc0] sm:$0xff] %v2015_v6  ;;  %761 = vst [vmem:[#allocation2 + $0xc8] sm:$0x7f] %v2015_v6  ;;  %v399_v13 = vld [vmem:[%s2185_s16 + $0x8] sm:$0xff]  ;;  %v425_v17 = vld [vmem:[%s2185_s16 + $0xd8] sm:$0xff]  ;;  %vm1406_vm9 = vcmask 31744  }
  0x1d   : > { %762 = vst [vmem:[#allocation2 + $0xd0] sm:$0xff] %v2015_v6  ;;  %763 = vst [vmem:[#allocation2 + $0xd8] sm:$0x7f] %v2015_v6  ;;  %1731 = vmatprep.mubr.msk.f32.mxu0 %vm468_vm0, %v399_v13  ;;  %1744 = vmatprep.mubr.msk.f32.mxu1 %vm468_vm0, %v425_v17  ;;  %v398_v32 = vld [vmem:[%s2185_s16] sm:$0xff]  ;;  %v424_v33 = vld [vmem:[%s2185_s16 + $0xd0] sm:$0xff]  ;;  %vm1491_vm10 = vcmask 1041408  }
  0x1e   : > { %765 = vst [vmem:[#allocation2 + $0xe8] sm:$0x7f] %v2015_v6  ;;  %1846 = vmatpush1.bf16.msra.mxu0 %v1845_v14  ;;  %1899 = vmatpush1.bf16.msra.mxu1 %v1845_v14  ;;  %v401_v34 = vld [vmem:[%s2185_s16 + $0x18] sm:$0xff]  ;;  %v427_v35 = vld [vmem:[%s2185_s16 + $0xe8] sm:$0xff]  ;;  %v400_v36 = vld [vmem:[%s2185_s16 + $0x10] sm:$0xff]  ;;  %vm1487_vm11 = vcmask 15360  }
  0x1f   : > { %1847 = vmatprep.subr.bf16.mxu0 %v2014_v3  ;;  %1890 = vmatprep.subr.bf16.mxu1 %v2014_v3  ;;  %v426_v37 = vld [vmem:[%s2185_s16 + $0xe0] sm:$0xff]  ;;  %v403_v38 = vld [vmem:[%s2185_s16 + $0x28] sm:$0xff]  ;;  %v429_v39 = vld [vmem:[%s2185_s16 + $0xf8] sm:$0xff]  ;;  %vm1569_vm12 = vcmask 1045504   ;;  %vm1565_vm13 = vcmask 48128   ;;  %s388_s30 = sand.u32 1, %s2004_s18  }
  0x20   : > { %v402_v40 = vld [vmem:[%s2185_s16 + $0x20] sm:$0xff]  ;;  %v428_v41 = vld [vmem:[%s2185_s16 + $0xf0] sm:$0xff]  ;;  %v405_v42 = vld [vmem:[%s2185_s16 + $0x38] sm:$0xff]  ;;  %s1759_s14 = sshll.u32 %s2099_s21, 4  ;;  %s389_s24 = scalar_lea.vmem [#allocation3], %s388_s30  ;;  %vm1645_vm14 = vcmask 8192  }
  0x21   : > { %v431_v43 = vld [vmem:[%s2185_s16 + $0x108] sm:$0xff]  ;;  %v404_v44 = vld [vmem:[%s2185_s16 + $0x30] sm:$0xff]  ;;  %v430_v45 = vld [vmem:[%s2185_s16 + $0x100] sm:$0xff]  ;;  %s1660_s15 = sshll.u32 %s389_s24, 4  ;;  %s1648_s29 = scalar_lea.sflag [#allocation4], %s388_s30  ;;  %s2651_s15 = int_to_ptr.vmem [resolvable:$true] %s1660_s15 }
  0x22   : > { %1849 = vmatpush1.bf16.msra.mxu0 %v1848_v18  ;;  %1900 = vmatpush1.bf16.msra.mxu1 %v1848_v18  ;;  %v407_v46 = vld [vmem:[%s2185_s16 + $0x48] sm:$0xff]  ;;  %v433_v47 = vld [vmem:[%s2185_s16 + $0x118] sm:$0xff]  ;;  %v406_v48 = vld [vmem:[%s2185_s16 + $0x40] sm:$0xff]  ;;  %s2017_s21 = smov [#allocation3]  }
  0x23   : > { %1850 = vmatprep.subr.bf16.mxu0 %v2014_v3  ;;  %1891 = vmatprep.subr.bf16.mxu1 %v2014_v3  ;;  %v432_v49 = vld [vmem:[%s2185_s16 + $0x110] sm:$0xff]  ;;  %v409_v50 = vld [vmem:[%s2185_s16 + $0x58] sm:$0xff]  ;;  %v435_v51 = vld [vmem:[%s2185_s16 + $0x128] sm:$0xff]  ;;  %s1954_s13 = sshll.u32 %s2017_s21, 4  ;;  %s1955_s13 = int_to_ptr.vmem [resolvable:$false] %s1954_s13 }
  0x24   : > { %v408_v52 = vld [vmem:[%s2185_s16 + $0x50] sm:$0xff]  ;;  %v434_v53 = vld [vmem:[%s2185_s16 + $0x120] sm:$0xff]  ;;  %v411_v54 = vld [vmem:[%s2185_s16 + $0x68] sm:$0xff]  ;;  %s1956_s0 = scalar_lea.vmem %s1955_s13, 32  ;;  %p1957_p0 = scmp.lt.s32.totalorder %s2651_s15, %s1955_s13 }
  0x25   : > { %v437_v55 = vld [vmem:[%s2185_s16 + $0x138] sm:$0xff]  ;;  %v410_v56 = vld [vmem:[%s2185_s16 + $0x60] sm:$0xff]  ;;  %v436_v57 = vld [vmem:[%s2185_s16 + $0x130] sm:$0xff] }
  0x26   : > { %1852 = vmatpush1.bf16.msra.mxu0 %v1851_v21  ;;  %1901 = vmatpush1.bf16.msra.mxu1 %v1851_v21  ;;  %v413_v58 = vld [vmem:[%s2185_s16 + $0x78] sm:$0xff]  ;;  %v439_v59 = vld [vmem:[%s2185_s16 + $0x148] sm:$0xff]  ;;  %v412_v60 = vld [vmem:[%s2185_s16 + $0x70] sm:$0xff] }
  0x27   : > { %1853 = vmatprep.subr.bf16.mxu0 %v2014_v3  ;;  %1892 = vmatprep.subr.bf16.mxu1 %v2014_v3  ;;  %v438_v61 = vld [vmem:[%s2185_s16 + $0x140] sm:$0xff]  ;;  %v415_v62 = vld [vmem:[%s2185_s16 + $0x88] sm:$0xff]  ;;  %v441_v63 = vld [vmem:[%s2185_s16 + $0x158] sm:$0xff] }
  0x28   : > { %v414_v0 = vld [vmem:[%s2185_s16 + $0x80] sm:$0xff]  ;;  %v440_v1 = vld [vmem:[%s2185_s16 + $0x150] sm:$0xff]  ;;  %v417_v2 = vld [vmem:[%s2185_s16 + $0x98] sm:$0xff] }
  0x29   : > { %v416_v4 = vld [vmem:[%s2185_s16 + $0x90] sm:$0xff]  ;;  %v419_v5 = vld [vmem:[%s2185_s16 + $0xa8] sm:$0xff]  ;;  %v418_v7 = vld [vmem:[%s2185_s16 + $0xa0] sm:$0xff] }
  0x2a   : > { %1855 = vmatpush1.bf16.msra.mxu0 %v1854_v24  ;;  %1902 = vmatpush1.bf16.msra.mxu1 %v1854_v24  ;;  %v421_v8 = vld [vmem:[%s2185_s16 + $0xb8] sm:$0xff]  ;;  %v420_v9 = vld [vmem:[%s2185_s16 + $0xb0] sm:$0xff]  ;;  %v423_v10 = vld [vmem:[%s2185_s16 + $0xc8] sm:$0xff] }
  0x2b   : > { %1856 = vmatprep.subr.bf16.mxu0 %v2014_v3  ;;  %1893 = vmatprep.subr.bf16.mxu1 %v2014_v3  ;;  %v422_v11 = vld [vmem:[%s2185_s16 + $0xc0] sm:$0xff]  ;;  %v1316_v13 = vld [vmem:[%s2695_s4 + $0x8] sm:$0xff]  ;;  %v1317_v14 = vld [vmem:[%s2695_s4 + $0x10] sm:$0xff]  ;;  %s2649_s16 = scalar_lea.hbm %s2702_s11, %s1759_s14 }
  0x2c   : > { %v1863_v15 = vpack.c.bf16 %v1316_v13, %v1315_v12  ;;  %v1866_v17 = vpack.c.bf16 %v1318_v16, %v1317_v14  ;;  %v1319_v18 = vld [vmem:[%s2695_s4 + $0x20] sm:$0xff]  ;;  %v1321_v21 = vld [vmem:[%s2695_s4 + $0x30] sm:$0xff] }
  0x2d   : > { %v1869_v20 = vpack.c.bf16 %v1320_v19, %v1319_v18  ;;  %v1872_v23 = vpack.c.bf16 %v1322_v22, %v1321_v21  ;;  %v1323_v24 = vld [vmem:[%s2695_s4 + $0x40] sm:$0xff] }
  0x2e   : > { %1858 = vmatpush1.bf16.msra.mxu0 %v1857_v27  ;;  %1903 = vmatpush1.bf16.msra.mxu1 %v1857_v27  ;;  %v1875_v26 = vpack.c.bf16 %v1324_v25, %v1323_v24  ;;  %v1325_v27 = vld [vmem:[%s2695_s4 + $0x50] sm:$0xff] }
  0x2f   : > { %1859 = vmatprep.subr.bf16.mxu0 %v2014_v3  ;;  %1894 = vmatprep.subr.bf16.mxu1 %v2014_v3  ;;  %v1878_v29 = vpack.c.bf16 %v1326_v28, %v1325_v27 }
  0x32   : > { %1861 = vmatpush1.bf16.msra.mxu0 %v1860_v30  ;;  %1904 = vmatpush1.bf16.msra.mxu1 %v1860_v30  ;;  %v1327_v30 = vld [vmem:[%s2695_s4 + $0x60] sm:$0xff] }
  0x33   : > { %575 = vmatprep.subr.mxu0 %v2015_v6  ;;  %1895 = vmatprep.subr.mxu1 %v2015_v6 }
  0x36   : > { %1730 = vmatpush1.msk.msra.mxu0 %vm535_vm1, %v460_v31  ;;  %1905 = vmatpush1.msk.msra.mxu1 %vm535_vm1, %v460_v31  ;;  %v1328_v31 = vld [vmem:[%s2695_s4 + $0x68] sm:$0xff] }
  0x37   : > { %604 = vmatmul.mubr.f32.vlgmr.msra.gmra.mrb[0].mxu0 %v398_v32  ;;  %669 = vmatmul.mubr.f32.vlgmr.msra.gmra.mrb[0].mxu1 %v424_v33  ;;  %v1881_v32 = vpack.c.bf16 %v1328_v31, %v1327_v30  ;;  %v1329_v33 = vld [vmem:[%s2695_s4 + $0x70] sm:$0xff] }
  0x38   : > { %1732 = vmatprep.mubr.msk.f32.mxu0 %vm468_vm0, %v401_v34  ;;  %1745 = vmatprep.mubr.msk.f32.mxu1 %vm468_vm0, %v427_v35  ;;  %v1330_v34 = vld [vmem:[%s2695_s4 + $0x78] sm:$0xff] }
  0x39   : > { %1862 = vmatprep.subr.bf16.mxu1 %v2014_v3  ;;  %v1884_v35 = vpack.c.bf16 %v1330_v34, %v1329_v33 }
  0x3a   : > { %1864 = vmatpush3.bf16.msra.mxu1 %v1863_v15 }
  0x3b   : > { %609 = vmatmul.mubr.f32.gmra.mrb[2].mxu0 %v400_v36  ;;  %674 = vmatmul.mubr.f32.gmra.mrb[2].mxu1 %v426_v37  ;;  %v2372_v36 = vld [vmem:[%s2694_s3] ss:$0 sm:$0xff] }
  0x3c   : > { %1733 = vmatprep.mubr.msk.f32.mxu0 %vm468_vm0, %v403_v38  ;;  %1746 = vmatprep.mubr.msk.f32.mxu1 %vm468_vm0, %v429_v39 }
  0x3d   : > { %1865 = vmatprep.subr.bf16.mxu1 %v2014_v3 }
  0x3e   : > { %1867 = vmatpush3.bf16.msra.mxu1 %v1866_v17 }
  0x3f   : > { %614 = vmatmul.mubr.f32.gmra.mrb[4].mxu0 %v402_v40  ;;  %679 = vmatmul.mubr.f32.gmra.mrb[4].mxu1 %v428_v41 }
  0x40   : > { %1734 = vmatprep.mubr.msk.f32.mxu0 %vm468_vm0, %v405_v42  ;;  %1747 = vmatprep.mubr.msk.f32.mxu1 %vm468_vm0, %v431_v43 }
  0x41   : > { %1868 = vmatprep.subr.bf16.mxu1 %v2014_v3 }
  0x42   : > { %1870 = vmatpush3.bf16.msra.mxu1 %v1869_v20 }
  0x43   : > { %619 = vmatmul.mubr.f32.gmra.mrb[6].mxu0 %v404_v44  ;;  %684 = vmatmul.mubr.f32.gmra.mrb[6].mxu1 %v430_v45 }
  0x44   : > { %1735 = vmatprep.mubr.msk.f32.mxu0 %vm468_vm0, %v407_v46  ;;  %1748 = vmatprep.mubr.msk.f32.mxu1 %vm468_vm0, %v433_v47 }
  0x45   : > { %1871 = vmatprep.subr.bf16.mxu1 %v2014_v3 }
  0x46   : > { %1873 = vmatpush3.bf16.msra.mxu1 %v1872_v23 }
  0x47   : > { %624 = vmatmul.mubr.f32.gmra.mrb[8].mxu0 %v406_v48  ;;  %689 = vmatmul.mubr.f32.gmra.mrb[8].mxu1 %v432_v49 }
  0x48   : > { %1736 = vmatprep.mubr.msk.f32.mxu0 %vm468_vm0, %v409_v50  ;;  %1749 = vmatprep.mubr.msk.f32.mxu1 %vm468_vm0, %v435_v51 }
  0x49   : > { %1874 = vmatprep.subr.bf16.mxu1 %v2014_v3 }
  0x4a   : > { %1876 = vmatpush3.bf16.msra.mxu1 %v1875_v26 }
  0x4b   : > { %629 = vmatmul.mubr.f32.gmra.mrb[10].mxu0 %v408_v52  ;;  %694 = vmatmul.mubr.f32.gmra.mrb[10].mxu1 %v434_v53 }
  0x4c   : > { %1737 = vmatprep.mubr.msk.f32.mxu0 %vm468_vm0, %v411_v54  ;;  %1750 = vmatprep.mubr.msk.f32.mxu1 %vm468_vm0, %v437_v55 }
  0x4d   : > { %1877 = vmatprep.subr.bf16.mxu1 %v2014_v3 }
  0x4e   : > { %1879 = vmatpush3.bf16.msra.mxu1 %v1878_v29 }
  0x4f   : > { %634 = vmatmul.mubr.f32.gmra.mrb[12].mxu0 %v410_v56  ;;  %699 = vmatmul.mubr.f32.gmra.mrb[12].mxu1 %v436_v57 }
  0x50   : > { %1738 = vmatprep.mubr.msk.f32.mxu0 %vm468_vm0, %v413_v58  ;;  %1751 = vmatprep.mubr.msk.f32.mxu1 %vm468_vm0, %v439_v59 }
  0x51   : > { %1880 = vmatprep.subr.bf16.mxu1 %v2014_v3 }
  0x52   : > { %1882 = vmatpush3.bf16.msra.mxu1 %v1881_v32 }
  0x53   : > { %639 = vmatmul.mubr.f32.gmra.mrb[14].mxu0 %v412_v60  ;;  %704 = vmatmul.mubr.f32.gmra.mrb[14].mxu1 %v438_v61 }
  0x54   : > { %1739 = vmatprep.mubr.msk.f32.mxu0 %vm468_vm0, %v415_v62  ;;  %1752 = vmatprep.mubr.msk.f32.mxu1 %vm468_vm0, %v441_v63 }
  0x55   : > { %1883 = vmatprep.subr.bf16.mxu1 %v2014_v3 }
  0x56   : > { %1885 = vmatpush3.bf16.msra.mxu1 %v1884_v35 }
  0x57   : > { %644 = vmatmul.mubr.f32.gmra.mrb[16].mxu0 %v414_v0  ;;  %709 = vmatmul.mubr.f32.gmra.mrb[16].mxu1 %v440_v1 }
  0x58   : > { %1740 = vmatprep.mubr.msk.f32.mxu0 %vm468_vm0, %v417_v2  ;;  %1817 = vmatprep.mubr.msk.f32.mxu1 %vm2016_vm2, %v2015_v6 }
  0x59   : > { %1820 = vmatprep.subr.mxu1 %v2015_v6 }
  0x5b   : > { %649 = vmatmul.mubr.f32.gmra.mrb[18].mxu0 %v416_v4 }
  0x5c   : > { %1741 = vmatprep.mubr.msk.f32.mxu0 %vm468_vm0, %v419_v5 }
  0x5f   : > { %654 = vmatmul.mubr.f32.gmra.mrb[20].mxu0 %v418_v7 }
  0x60   : > { %1742 = vmatprep.mubr.msk.f32.mxu0 %vm468_vm0, %v421_v8 }
  0x63   : > { %659 = vmatmul.mubr.f32.gmra.mrb[22].mxu0 %v420_v9 }
  0x64   : > { %1743 = vmatprep.mubr.msk.f32.mxu0 %vm468_vm0, %v423_v10 }
  0x67   : > { %664 = vmatmul.mubr.f32.gmra.mrb[24].mxu0 %v422_v11 }
 0x10a   : > { %v605_v37 = vpop.f32.mrb[0].mxu0  ;;  %v670_v38 = vpop.f32.mrb[0].mxu1 }
 0x10b   : > { %v606_v39 = vadd.f32 %v2372_v36, %v605_v37  ;;  %v607_v40 = vpop.f32.mrb[1].mxu0  ;;  %v671_v41 = vadd.f32 %v2372_v36, %v670_v38  ;;  %v672_v42 = vpop.f32.mrb[1].mxu1 }
 0x10d   : > { %v714_v43 = vmax.f32 %v606_v39, 0.0  ;;  %v727_v44 = vmax.f32 %v671_v41, 0.0 }
 0x10e   : > { %v610_v45 = vpop.f32.mrb[2].mxu0  ;;  %v675_v3 = vpop.f32.mrb[2].mxu1 }
 0x10f   : > { %767 = vst [vmem:[#allocation2 + $0x11] sm:$0xff] %v714_v43  ;;  %v611_v6 = vadd.f32 %v2372_v36, %v610_v45  ;;  %v612_v46 = vpop.f32.mrb[3].mxu0  ;;  %795 = vst [vmem:[#allocation2 + $0x91] sm:$0xff] %v727_v44  ;;  %v676_v47 = vadd.f32 %v2372_v36, %v675_v3  ;;  %v677_v48 = vpop.f32.mrb[3].mxu1 }
 0x111   : > { %v715_v49 = vmax.f32 %v611_v6, 0.0  ;;  %v728_v50 = vmax.f32 %v676_v47, 0.0 }
 0x112   : > { %v615_v51 = vpop.f32.mrb[4].mxu0  ;;  %v680_v52 = vpop.f32.mrb[4].mxu1 }
 0x113   : > { %768 = vst [vmem:[#allocation2 + $0x19] sm:$0x1f] %v715_v49  ;;  %770 = vst [vmem:[#allocation2 + $0x1c] sm:$0xe0] %v715_v49  ;;  %v616_v53 = vadd.f32 %v2372_v36, %v615_v51  ;;  %v617_v54 = vpop.f32.mrb[5].mxu0  ;;  %v681_v55 = vadd.f32 %v2372_v36, %v680_v52  ;;  %v682_v56 = vpop.f32.mrb[5].mxu1 }
 0x114   : > { %796 = vst [vmem:[#allocation2 + $0x99] sm:$0x1f] %v728_v50  ;;  %798 = vst [vmem:[#allocation2 + $0x9c] sm:$0xe0] %v728_v50  ;;  %v813_v50 = vld [vmem:[#allocation2 + $0x8] sm:$0x7f] }
 0x115   : > { %v716_v57 = vmax.f32 %v616_v53, 0.0  ;;  %v729_v58 = vmax.f32 %v681_v55, 0.0 }
 0x116   : > { %v620_v59 = vpop.f32.mrb[6].mxu0  ;;  %v685_v60 = vpop.f32.mrb[6].mxu1  ;;  %v814_v48 = vld [vmem:[#allocation2 + $0x10] sm:$0xff] }
 0x117   : > { %771 = vst [vmem:[#allocation2 + $0x24] sm:$0xff] %v716_v57  ;;  %v621_v61 = vadd.f32 %v2372_v36, %v620_v59  ;;  %v622_v62 = vpop.f32.mrb[7].mxu0  ;;  %799 = vst [vmem:[#allocation2 + $0xa4] sm:$0xff] %v729_v58  ;;  %v686_v63 = vadd.f32 %v2372_v36, %v685_v60  ;;  %v687_v0 = vpop.f32.mrb[7].mxu1  ;;  %v821_v57 = vsel %vm820_vm4, %v813_v50, -inf }
 0x119   : > { %v717_v1 = vmax.f32 %v621_v61, 0.0  ;;  %v730_v2 = vmax.f32 %v686_v63, 0.0 }
 0x11a   : > { %v625_v4 = vpop.f32.mrb[8].mxu0  ;;  %v690_v5 = vpop.f32.mrb[8].mxu1  ;;  %v815_v0 = vld [vmem:[#allocation2 + $0x18] sm:$0x7f] }
 0x11b   : > { %772 = vst [vmem:[#allocation2 + $0x2c] sm:$0x3] %v717_v1  ;;  %774 = vst [vmem:[#allocation2 + $0x2f] sm:$0xfc] %v717_v1  ;;  %v626_v7 = vadd.f32 %v2372_v36, %v625_v4  ;;  %v627_v8 = vpop.f32.mrb[9].mxu0  ;;  %v691_v9 = vadd.f32 %v2372_v36, %v690_v5  ;;  %v692_v10 = vpop.f32.mrb[9].mxu1 }
 0x11c   : > { %800 = vst [vmem:[#allocation2 + $0xac] sm:$0x3] %v730_v2  ;;  %802 = vst [vmem:[#allocation2 + $0xaf] sm:$0xfc] %v730_v2 }
 0x11d   : > { %v718_v11 = vmax.f32 %v626_v7, 0.0  ;;  %v731_v12 = vmax.f32 %v691_v9, 0.0  ;;  %v822_v7 = vsel %vm820_vm4, %v815_v0, -inf }
 0x11e   : > { %v630_v13 = vpop.f32.mrb[10].mxu0  ;;  %v695_v14 = vpop.f32.mrb[10].mxu1  ;;  %v2389_v43 = vld [vmem:[#allocation2 + $0x20] sm:$0xff] }
 0x11f   : > { %775 = vst [vmem:[#allocation2 + $0x37] sm:$0x7f] %v718_v11  ;;  %777 = vst [vmem:[#allocation2 + $0x3a] sm:$0x80] %v718_v11  ;;  %v631_v15 = vadd.f32 %v2372_v36, %v630_v13  ;;  %v632_v16 = vpop.f32.mrb[11].mxu0  ;;  %v696_v17 = vadd.f32 %v2372_v36, %v695_v14  ;;  %v697_v18 = vpop.f32.mrb[11].mxu1 }
 0x120   : > { %803 = vst [vmem:[#allocation2 + $0xb7] sm:$0x7f] %v731_v12  ;;  %805 = vst [vmem:[#allocation2 + $0xba] sm:$0x80] %v731_v12  ;;  %v818_v45 = vmax.f32 %v2389_v43, 0.0 }
 0x121   : > { %v719_v19 = vmax.f32 %v631_v15, 0.0  ;;  %v732_v20 = vmax.f32 %v696_v17, 0.0 }
 0x122   : > { %v635_v21 = vpop.f32.mrb[12].mxu0  ;;  %v700_v22 = vpop.f32.mrb[12].mxu1  ;;  %v2394_v49 = vmax.f32 %v818_v45, %v814_v48  ;;  %v817_v51 = vld [vmem:[#allocation2 + $0x28] sm:$0x7f] }
 0x123   : > { %778 = vst [vmem:[#allocation2 + $0x42] sm:$0xff] %v719_v19  ;;  %v637_v23 = vpop.f32.mrb[13].mxu0  ;;  %806 = vst [vmem:[#allocation2 + $0xc2] sm:$0xff] %v732_v20  ;;  %v702_v24 = vpop.f32.mrb[13].mxu1  ;;  %v636_v25 = vadd.f32 %v2372_v36, %v635_v21  ;;  %v823_v58 = vsel %vm820_vm4, %v817_v51, -inf  ;;  %v701_v63 = vadd.f32 %v2372_v36, %v700_v22 }
 0x124   : > { %v826_v59 = vsel %vm535_vm1, %v2394_v49, -inf  ;;  %v835_v60 = vsel %vm834_vm3, %v2394_v49, -inf  ;;  %v824_v1 = vmax.f32 %v821_v57, %v823_v58  ;;  %v844_v9 = vsel %vm843_vm5, %v2394_v49, -inf  ;;  %v889_v17 = vld [vmem:[#allocation2 + $0x28] sm:$0x7f] }
 0x125   : > { %v720_v28 = vmax.f32 %v636_v25, 0.0  ;;  %v827_v2 = vrot.slane %v826_v59, 4  ;;  %v836_v4 = vrot.slane %v835_v60, 4  ;;  %v733_v8 = vmax.f32 %v701_v63, 0.0  ;;  %v1106_v63 = vld [vmem:[#allocation2 + $0xa8] sm:$0x7f] }
 0x126   : > { %v640_v26 = vpop.f32.mrb[14].mxu0  ;;  %v705_v27 = vpop.f32.mrb[14].mxu1  ;;  %v2408_v10 = vmax.f32 %v824_v1, %v822_v7  ;;  %v845_v19 = vrot.slane %v844_v9, 4  ;;  %v1173_v7 = vld [vmem:[#allocation2 + $0xa8] sm:$0x7f] }
 0x127   : > { %v641_v29 = vadd.f32 %v2372_v36, %v640_v26  ;;  %v642_v30 = vpop.f32.mrb[15].mxu0  ;;  %v707_v31 = vpop.f32.mrb[15].mxu1  ;;  %779 = vst [vmem:[#allocation2 + $0x4a] ss:$7 sps:$4 sm:$0xff] %v720_v28   ;;  %v706_v13 = vadd.f32 %v2372_v36, %v705_v27  ;;  %v828_v15 = vmax.f32 %v826_v59, %v827_v2  ;;  %v837_v16 = vmax.f32 %v835_v60, %v836_v4  ;;  %v890_v26 = vld [vmem:[#allocation2 + $0x30] sm:$0xff] }
 0x128   : > { %807 = vst [vmem:[#allocation2 + $0xca] ss:$7 sps:$4 sm:$0xff] %v733_v8   ;;  %v864_v23 = vsel %vm535_vm1, %v2408_v10, -inf  ;;  %v891_v27 = vld [vmem:[#allocation2 + $0x38] sm:$0x7f]  ;;  %v872_v31 = vsel %vm834_vm3, %v2408_v10, -inf }
 0x129   : > { %v721_v32 = vmax.f32 %v641_v29, 0.0  ;;  %v734_v18 = vmax.f32 %v706_v13, 0.0  ;;  %v829_v24 = vrot.slane %v828_v15, 2  ;;  %v838_v25 = vrot.slane %v837_v16, 2  ;;  %v1104_v59 = vld [vmem:[#allocation2 + $0x98] sm:$0x7f] }
 0x12a   : > { %v645_v33 = vpop.f32.mrb[16].mxu0  ;;  %v710_v34 = vpop.f32.mrb[16].mxu1  ;;  %v2410_v11 = vld [vmem:[#allocation2 + $0x40] sm:$0xff]  ;;  %v846_v29 = vmax.f32 %v844_v9, %v845_v19  ;;  %v865_v30 = vrot.slane %v864_v23, 4 }
 0x12b   : > { %782 = vst [vmem:[#allocation2 + $0x55] sm:$0xff] %v721_v32  ;;  %v646_v35 = vadd.f32 %v2372_v36, %v645_v33  ;;  %v647_v37 = vpop.f32.mrb[17].mxu0  ;;  %v712_v38 = vpop.f32.mrb[17].mxu1  ;;  %v711_v14 = vadd.f32 %v2372_v36, %v710_v34  ;;  %v894_v20 = vmax.f32 %v2389_v43, %v2410_v11  ;;  %810 = vst [vmem:[#allocation2 + $0xd5] sm:$0xff] %v734_v18 }
 0x12c   : > { %v830_v33 = vmax.f32 %v828_v15, %v829_v24  ;;  %v839_v34 = vmax.f32 %v837_v16, %v838_v25  ;;  %v897_v37 = vsel %vm820_vm4, %v891_v27, -inf  ;;  %v873_v38 = vrot.slane %v872_v31, 4 }
 0x12d   : > { %v722_v39 = vmax.f32 %v646_v35, 0.0  ;;  %v735_v22 = vmax.f32 %v711_v14, 0.0  ;;  %v2422_v32 = vmax.f32 %v894_v20, %v890_v26  ;;  %v880_v35 = vsel %vm843_vm5, %v2408_v10, -inf }
 0x12e   : > { %v650_v40 = vpop.f32.mrb[18].mxu0  ;;  %v893_v12 = vld [vmem:[#allocation2 + $0x48] sm:$0x7f]  ;;  %v831_v45 = vrot.slane %v830_v33, 1  ;;  %v2457_v20 = vsel %vm820_vm4, %v1173_v7, -inf }
 0x12f   : > { %783 = vst [vmem:[#allocation2 + $0x5d] sm:$0x1] %v722_v39  ;;  %785 = vst [vmem:[#allocation2 + $0x60] sm:$0xfe] %v722_v39  ;;  %v652_v41 = vpop.f32.mrb[19].mxu0  ;;  %v651_v6 = vadd.f32 %v2372_v36, %v650_v40  ;;  %v898_v21 = vsel %vm820_vm4, %v893_v12, -inf }
 0x130   : > { %811 = vst [vmem:[#allocation2 + $0xdd] sm:$0x1] %v735_v22  ;;  %v847_v40 = vrot.slane %v846_v29, 2  ;;  %v866_v41 = vmax.f32 %v864_v23, %v865_v30  ;;  %v909_v43 = vsel %vm834_vm3, %v2422_v32, -inf  ;;  %v832_v60 = vmax.f32 %v830_v33, %v831_v45 }
 0x131   : > { %v723_v53 = vmax.f32 %v651_v6, 0.0  ;;  %v917_v6 = vsel %vm843_vm5, %v2422_v32, -inf  ;;  %v910_v50 = vrot.slane %v909_v43, 4 }
 0x132   : > { %v655_v42 = vpop.f32.mrb[20].mxu0  ;;  %v961_v13 = vld [vmem:[#allocation2 + $0x50] sm:$0xff] }
 0x133   : > { %v657_v44 = vpop.f32.mrb[21].mxu0  ;;  %v656_v47 = vadd.f32 %v2372_v36, %v655_v42  ;;  %786 = vst [vmem:[#allocation2 + $0x68] sm:$0x3f] %v723_v53  ;;  %788 = vst [vmem:[#allocation2 + $0x6b] sm:$0xc0] %v723_v53  ;;  %v901_v42 = vsel %vm535_vm1, %v2422_v32, -inf  ;;  %v848_v53 = vmax.f32 %v846_v29, %v847_v40  ;;  %v911_v4 = vmax.f32 %v909_v43, %v910_v50 }
 0x134   : > { %v881_v44 = vrot.slane %v880_v35, 4  ;;  %v902_v48 = vrot.slane %v901_v42, 4  ;;  %v960_v43 = vld [vmem:[#allocation2 + $0x48] sm:$0x7f] }
 0x135   : > { %v724_v55 = vmax.f32 %v656_v47, 0.0  ;;  %v874_v47 = vmax.f32 %v872_v31, %v873_v38  ;;  %v849_v8 = vrot.slane %v848_v53, 1  ;;  %v912_v25 = vrot.slane %v911_v4, 2 }
 0x136   : > { %v660_v3 = vpop.f32.mrb[22].mxu0  ;;  %v903_v2 = vmax.f32 %v901_v42, %v902_v48 }
 0x137   : > { %v662_v46 = vpop.f32.mrb[23].mxu0  ;;  %v661_v56 = vadd.f32 %v2372_v36, %v660_v3  ;;  %789 = vst [vmem:[#allocation2 + $0x73] sm:$0xff] %v724_v55  ;;  %v840_v3 = vrot.slane %v839_v34, 1  ;;  %v882_v55 = vmax.f32 %v880_v35, %v881_v44  ;;  %v875_v1 = vrot.slane %v874_v47, 2 }
 0x138   : > { %v2435_v46 = vld [vmem:[#allocation2 + $0x60] sm:$0xff]  ;;  %v904_v24 = vrot.slane %v903_v2, 2 }
 0x139   : > { %v725_v61 = vmax.f32 %v661_v56, 0.0  ;;  %v918_v56 = vrot.slane %v917_v6, 4  ;;  %v965_v58 = vmax.f32 %v2410_v11, %v2435_v46  ;;  %v2449_v11 = vsel %vm820_vm4, %v1104_v59, -inf }
 0x13a   : > { %v665_v52 = vpop.f32.mrb[24].mxu0  ;;  %v883_v14 = vrot.slane %v882_v55, 2  ;;  %v876_v23 = vmax.f32 %v874_v47, %v875_v1  ;;  %v964_v33 = vld [vmem:[#allocation2 + $0x68] sm:$0x7f]  ;;  %v905_v42 = vmax.f32 %v903_v2, %v904_v24 }
 0x13b   : > { %v667_v54 = vpop.f32.mrb[25].mxu0  ;;  %v666_v62 = vadd.f32 %v2372_v36, %v665_v52  ;;  %790 = vst [vmem:[#allocation2 + $0x7b] sm:$0x7] %v725_v61  ;;  %792 = vst [vmem:[#allocation2 + $0x7e] sm:$0xf8] %v725_v61  ;;  %v896_v36 = vsel %vm820_vm4, %v889_v17, -inf  ;;  %v841_v61 = vmax.f32 %v839_v34, %v840_v3  ;;  %v919_v15 = vmax.f32 %v917_v6, %v918_v56 }
 0x13c   : > { %v899_v28 = vmax.f32 %v896_v36, %v898_v21  ;;  %v1248_v52 = vld [vmem:[#allocation2 + $0xe8] sm:$0x7f]  ;;  %v867_v54 = vrot.slane %v866_v41, 2  ;;  %v2451_v16 = vmax.f32 %v965_v58, %v961_v13  ;;  %v2454_v17 = vsel %vm820_vm4, %v1106_v63, -inf  ;;  %v1175_v63 = vld [vmem:[#allocation2 + $0xb8] sm:$0x7f] }
 0x13d   : > { %v726_v5 = vmax.f32 %v666_v62, 0.0  ;;  %v2444_v0 = vsel %vm820_vm4, %v1248_v52, -inf  ;;  %v855_v21 = vsel %vm854_vm7, %v2408_v10, -inf  ;;  %v842_v22 = vadd.f32 %v841_v61, %v832_v60 }
 0x13e   : > { %v2427_v39 = vmax.f32 %v899_v28, %v897_v37  ;;  %v868_v9 = vmax.f32 %v866_v41, %v867_v54  ;;  %v850_v36 = vmax.f32 %v848_v53, %v849_v8  ;;  %v853_v28 = vsel %vm852_vm6, %v2394_v49, -inf }
 0x13f   : > { %793 = vst [vmem:[#allocation2 + $0x86] sm:$0xff] %v726_v5  ;;  %v884_v29 = vmax.f32 %v882_v55, %v883_v14  ;;  %v920_v30 = vrot.slane %v919_v15, 2  ;;  %v972_v31 = vsel %vm535_vm1, %v2451_v16, -inf  ;;  %v856_v34 = vmax.f32 %v853_v28, %v855_v21 }
 0x140   : > { %v935_v51 = vsel %vm535_vm1, %v2427_v39, -inf  ;;  %v943_v57 = vsel %vm834_vm3, %v2427_v39, -inf  ;;  %v951_v5 = vsel %vm843_vm5, %v2427_v39, -inf  ;;  %v869_v26 = vrot.slane %v868_v9, 1 }
 0x141   : > { %v936_v62 = vrot.slane %v935_v51, 4  ;;  %v944_v12 = vrot.slane %v943_v57, 4  ;;  %v952_v19 = vrot.slane %v951_v5, 4  ;;  %v980_v10 = vsel %vm834_vm3, %v2451_v16, -inf }
 0x142   : > { %v926_v38 = vsel %vm854_vm7, %v2427_v39, -inf  ;;  %v2469_v40 = vadd.f32 %v850_v36, %v842_v22  ;;  %v877_v41 = vrot.slane %v876_v23, 1  ;;  %v913_v49 = vmax.f32 %v911_v4, %v912_v25  ;;  %v1177_v25 = vld [vmem:[#allocation2 + $0xc8] sm:$0x7f] }
 0x143   : > { %v937_v18 = vmax.f32 %v935_v51, %v936_v62  ;;  %v945_v27 = vmax.f32 %v943_v57, %v944_v12  ;;  %v953_v37 = vmax.f32 %v951_v5, %v952_v19  ;;  %v973_v45 = vrot.slane %v972_v31, 4  ;;  %v962_v57 = vld [vmem:[#allocation2 + $0x58] sm:$0x7f] }
 0x144   : > { %v969_v3 = vsel %vm820_vm4, %v964_v33, -inf  ;;  %v925_v6 = vsel %vm852_vm6, %v2422_v32, -inf  ;;  %v2474_v47 = vmax.f32 %v868_v9, %v869_v26  ;;  %v981_v48 = vrot.slane %v980_v10, 4 }
 0x145   : > { %v938_v35 = vrot.slane %v937_v18, 2  ;;  %v946_v44 = vrot.slane %v945_v27, 2  ;;  %v857_v50 = vrot.slane %v856_v34, 4  ;;  %v927_v51 = vmax.f32 %v925_v6, %v926_v38  ;;  %v1174_v6 = vld [vmem:[#allocation2 + $0xb0] sm:$0xff] }
 0x146   : > { %v921_v52 = vmax.f32 %v919_v15, %v920_v30  ;;  %v954_v53 = vrot.slane %v953_v37, 2  ;;  %v967_v54 = vsel %vm820_vm4, %v960_v43, -inf  ;;  %v2477_v55 = vmax.f32 %v876_v23, %v877_v41  ;;  %v2502_v43 = vld [vmem:[#allocation2 + $0x80] sm:$0xff] }
 0x147   : > { %v939_v39 = vmax.f32 %v937_v18, %v938_v35  ;;  %v885_v56 = vrot.slane %v884_v29, 1  ;;  %v970_v58 = vmax.f32 %v967_v54, %v969_v3  ;;  %v858_v59 = vmax.f32 %v856_v34, %v857_v50  ;;  %v2483_v18 = vld [vmem:[#allocation2 + $0xc0] sm:$0xff]  ;;  %v1031_v54 = vld [vmem:[#allocation2 + $0x68] sm:$0x7f] }
 0x148   : > { %v906_v60 = vrot.slane %v905_v42, 1  ;;  %v914_v61 = vrot.slane %v913_v49, 1  ;;  %v947_v62 = vmax.f32 %v945_v27, %v946_v44  ;;  %v974_v32 = vmax.f32 %v972_v31, %v973_v45  ;;  %v2489_v27 = vld [vmem:[#allocation2 + $0xa0] sm:$0xff]  ;;  %v1035_v44 = vld [vmem:[#allocation2 + $0x88] sm:$0x7f] }
 0x149   : > { %v982_v1 = vmax.f32 %v980_v10, %v981_v48  ;;  %v988_v2 = vsel %vm843_vm5, %v2451_v16, -inf  ;;  %v859_v4 = vrot.slane %v858_v59, 2  ;;  %v928_v5 = vrot.slane %v927_v51, 4 }
 0x14a   : > { %v922_v7 = vrot.slane %v921_v52, 1  ;;  %v940_v8 = vrot.slane %v939_v39, 1  ;;  %v955_v9 = vmax.f32 %v953_v37, %v954_v53  ;;  %v968_v12 = vsel %vm820_vm4, %v962_v57, -inf }
 0x14b   : > { %v886_v13 = vmax.f32 %v884_v29, %v885_v56  ;;  %v971_v14 = vmax.f32 %v970_v58, %v968_v12  ;;  %v1181_v15 = vsel %vm820_vm4, %v1175_v63, -inf  ;;  %v860_v19 = vmax.f32 %v858_v59, %v859_v4 }
 0x14c   : > { %v2485_v21 = vmax.f32 %v905_v42, %v906_v60  ;;  %v948_v22 = vrot.slane %v947_v62, 1  ;;  %v975_v23 = vrot.slane %v974_v32, 2  ;;  %v989_v24 = vrot.slane %v988_v2, 4 }
 0x14d   : > { %v2487_v36 = vmax.f32 %v913_v49, %v914_v61  ;;  %v983_v26 = vrot.slane %v982_v1, 2  ;;  %v861_v28 = vrot.slane %v860_v19, 1  ;;  %v929_v30 = vmax.f32 %v927_v51, %v928_v5  ;;  %v1032_v5 = vld [vmem:[#allocation2 + $0x70] sm:$0xff] }
 0x14e   : > { %v2491_v29 = vmax.f32 %v921_v52, %v922_v7  ;;  %v2493_v31 = vmax.f32 %v939_v39, %v940_v8  ;;  %v956_v33 = vrot.slane %v955_v9, 1  ;;  %v1178_v34 = vmax.f32 %v2489_v27, %v2483_v18  ;;  %v1102_v8 = vld [vmem:[#allocation2 + $0x88] sm:$0x7f] }
 0x14f   : > { %v1006_v35 = vsel %vm535_vm1, %v971_v14, -inf  ;;  %v1014_v37 = vsel %vm834_vm3, %v971_v14, -inf  ;;  %v1182_v10 = vsel %vm820_vm4, %v1177_v25, -inf  ;;  %v862_v38 = vmax.f32 %v860_v19, %v861_v28 }
 0x150   : > { %v2500_v41 = vmax.f32 %v947_v62, %v948_v22  ;;  %v976_v42 = vmax.f32 %v974_v32, %v975_v23  ;;  %v990_v49 = vmax.f32 %v988_v2, %v989_v24  ;;  %v997_v45 = vsel %vm854_vm7, %v971_v14, -inf }
 0x151   : > { %v984_v3 = vmax.f32 %v982_v1, %v983_v26  ;;  %v863_v48 = vadd.f32 %v862_v38, %v2469_v40  ;;  %v930_v50 = vrot.slane %v929_v30, 2  ;;  %v996_v51 = vsel %vm852_vm6, %v2451_v16, -inf  ;;  %v1033_v1 = vld [vmem:[#allocation2 + $0x78] sm:$0x7f] }
 0x152   : > { %v1007_v52 = vrot.slane %v1006_v35, 4  ;;  %v1015_v39 = vrot.slane %v1014_v37, 4  ;;  %v1022_v53 = vsel %vm843_vm5, %v971_v14, -inf  ;;  %v1183_v56 = vmax.f32 %v2457_v20, %v1182_v10 }
 0x153   : > { %v1036_v57 = vmax.f32 %v2435_v46, %v2502_v43  ;;  %v1040_v58 = vsel %vm820_vm4, %v1035_v44, -inf  ;;  %v871_v59 = vadd.f32 %v2474_v47, %v863_v48  ;;  %v998_v60 = vmax.f32 %v996_v51, %v997_v45  ;;  %v1103_v45 = vld [vmem:[#allocation2 + $0x90] sm:$0xff] }
 0x154   : > { %v2514_v40 = vmax.f32 %v955_v9, %v956_v33  ;;  %v977_v61 = vrot.slane %v976_v42, 1  ;;  %v991_v62 = vrot.slane %v990_v49, 2  ;;  %v2516_v16 = vmax.f32 %v1178_v34, %v1174_v6 }
 0x155   : > { %v1023_v32 = vrot.slane %v1022_v53, 4  ;;  %v1038_v63 = vsel %vm820_vm4, %v1031_v54, -inf  ;;  %v879_v20 = vadd.f32 %v2477_v55, %v871_v59  ;;  %v931_v2 = vmax.f32 %v929_v30, %v930_v50 }
 0x156   : > { %v1008_v4 = vmax.f32 %v1006_v35, %v1007_v52  ;;  %v1016_v46 = vmax.f32 %v1014_v37, %v1015_v39  ;;  %v1041_v7 = vmax.f32 %v1038_v63, %v1040_v58  ;;  %v2520_v47 = vmax.f32 %v1183_v56, %v1181_v15 }
 0x157   : > { %v985_v9 = vrot.slane %v984_v3, 1  ;;  %v1037_v12 = vmax.f32 %v1036_v57, %v1032_v5  ;;  %v887_v14 = vadd.f32 %v886_v13, %v879_v20  ;;  %v999_v19 = vrot.slane %v998_v60, 4 }
 0x158   : > { %v2522_v22 = vmax.f32 %v976_v42, %v977_v61  ;;  %v992_v23 = vmax.f32 %v990_v49, %v991_v62  ;;  %v1039_v24 = vsel %vm820_vm4, %v1033_v1, -inf  ;;  %v1209_v55 = vsel %vm852_vm6, %v2516_v16, -inf  ;;  %v1244_v61 = vld [vmem:[#allocation2 + $0xc8] sm:$0x7f]  ;;  %v2547_v62 = vld [vmem:[#allocation2] sm:$0xff] }
 0x159   : > { %v1024_v25 = vmax.f32 %v1022_v53, %v1023_v32  ;;  %v1109_v26 = vsel %vm820_vm4, %v1102_v8, -inf  ;;  %v908_v28 = vadd.f32 %v2485_v21, %v887_v14  ;;  %v932_v30 = vrot.slane %v931_v2, 1 }
 0x15a   : > { %v1009_v15 = vrot.slane %v1008_v4, 2  ;;  %v1017_v33 = vrot.slane %v1016_v46, 2  ;;  %v1042_v34 = vmax.f32 %v1041_v7, %v1039_v24  ;;  %v1210_v13 = vsel %vm854_vm7, %v2520_v47, -inf }
 0x15b   : > { %v1043_v35 = vsel %vm535_vm1, %v1037_v12, -inf  ;;  %v916_v37 = vadd.f32 %v2487_v36, %v908_v28  ;;  %v1000_v10 = vmax.f32 %v998_v60, %v999_v19  ;;  %v2533_v38 = vmax.f32 %v1209_v55, %v1210_v13 }
 0x15c   : > { %v986_v42 = vmax.f32 %v984_v3, %v985_v9  ;;  %v993_v49 = vrot.slane %v992_v23, 1  ;;  %v1107_v44 = vmax.f32 %v2502_v43, %v2489_v27  ;;  %v1112_v21 = vmax.f32 %v1109_v26, %v2454_v17 }
 0x15d   : > { %v1051_v6 = vsel %vm834_vm3, %v1037_v12, -inf  ;;  %v1059_v48 = vsel %vm843_vm5, %v1037_v12, -inf  ;;  %v924_v50 = vadd.f32 %v2491_v29, %v916_v37  ;;  %v933_v51 = vmax.f32 %v931_v2, %v932_v30 }
 0x15e   : > { %v1025_v52 = vrot.slane %v1024_v25, 2  ;;  %v1044_v36 = vrot.slane %v1043_v35, 4  ;;  %v1067_v39 = vsel %vm852_vm6, %v1037_v12, -inf  ;;  %v1068_v3 = vsel %vm854_vm7, %v1042_v34, -inf }
 0x15f   : > { %v1010_v53 = vmax.f32 %v1008_v4, %v1009_v15  ;;  %v2543_v54 = vmax.f32 %v1016_v46, %v1017_v33  ;;  %v934_v27 = vadd.f32 %v933_v51, %v924_v50  ;;  %v1001_v43 = vrot.slane %v1000_v10, 2  ;;  %v1245_v4 = vld [vmem:[#allocation2 + $0xd0] sm:$0xff]  ;;  %v1246_v46 = vld [vmem:[#allocation2 + $0xd8] sm:$0x7f] }
 0x160   : > { %v994_v17 = vmax.f32 %v992_v23, %v993_v49  ;;  %v1052_v56 = vrot.slane %v1051_v6, 4  ;;  %v1060_v57 = vrot.slane %v1059_v48, 4  ;;  %v1108_v58 = vmax.f32 %v1107_v44, %v1103_v45 }
 0x161   : > { %v1077_v59 = vsel %vm535_vm1, %v1042_v34, -inf  ;;  %v942_v29 = vadd.f32 %v2493_v31, %v934_v27  ;;  %v1069_v60 = vmax.f32 %v1067_v39, %v1068_v3  ;;  %v1249_v32 = vmax.f32 %v2483_v18, %v2547_v62 }
 0x162   : > { %v1026_v63 = vmax.f32 %v1024_v25, %v1025_v52  ;;  %v1045_v1 = vmax.f32 %v1043_v35, %v1044_v36  ;;  %v1085_v20 = vsel %vm834_vm3, %v1042_v34, -inf  ;;  %v2553_v2 = vmax.f32 %v1112_v21, %v2449_v11 }
 0x163   : > { %v1011_v5 = vrot.slane %v1010_v53, 1  ;;  %v1019_v7 = vrot.slane %v2543_v54, 1  ;;  %v950_v31 = vadd.f32 %v2500_v41, %v942_v29  ;;  %v1002_v8 = vmax.f32 %v1000_v10, %v1001_v43 }
 0x164   : > { %v1053_v9 = vmax.f32 %v1051_v6, %v1052_v56  ;;  %v1061_v12 = vmax.f32 %v1059_v48, %v1060_v57  ;;  %v1078_v14 = vrot.slane %v1077_v59, 4  ;;  %v1251_v18 = vsel %vm820_vm4, %v1244_v61, -inf }
 0x165   : > { %v958_v19 = vadd.f32 %v2514_v40, %v950_v31  ;;  %v1070_v23 = vrot.slane %v1069_v60, 4  ;;  %v2559_v24 = vmax.f32 %v1249_v32, %v1245_v4  ;;  %v1252_v11 = vsel %vm820_vm4, %v1246_v46, -inf }
 0x166   : > { %v1027_v55 = vrot.slane %v1026_v63, 1  ;;  %v1046_v25 = vrot.slane %v1045_v1, 2  ;;  %v1086_v26 = vrot.slane %v1085_v20, 4  ;;  %v1254_v28 = vmax.f32 %v1251_v18, %v2444_v0 }
 0x167   : > { %v1012_v30 = vmax.f32 %v1010_v53, %v1011_v5  ;;  %v1093_v41 = vsel %vm843_vm5, %v1042_v34, -inf  ;;  %v979_v15 = vadd.f32 %v2522_v22, %v958_v19  ;;  %v1003_v33 = vrot.slane %v1002_v8, 1 }
 0x168   : > { %v1054_v13 = vrot.slane %v1053_v9, 2  ;;  %v1062_v35 = vrot.slane %v1061_v12, 2  ;;  %v1079_v37 = vmax.f32 %v1077_v59, %v1078_v14  ;;  %v2565_v40 = vmax.f32 %v1254_v28, %v1252_v11 }
 0x169   : > { %v1114_v10 = vsel %vm535_vm1, %v1108_v58, -inf  ;;  %v987_v49 = vadd.f32 %v986_v42, %v979_v15  ;;  %v1071_v44 = vmax.f32 %v1069_v60, %v1070_v23  ;;  %v1280_v21 = vsel %vm852_vm6, %v2559_v24, -inf }
 0x16a   : > { %v1047_v45 = vmax.f32 %v1045_v1, %v1046_v25  ;;  %v1087_v0 = vmax.f32 %v1085_v20, %v1086_v26  ;;  %v1094_v6 = vrot.slane %v1093_v41, 4  ;;  %v1281_v34 = vsel %vm854_vm7, %v2565_v40, -inf }
 0x16b   : > { %v1122_v22 = vsel %vm834_vm3, %v1108_v58, -inf  ;;  %v995_v48 = vadd.f32 %v994_v17, %v987_v49  ;;  %v1004_v50 = vmax.f32 %v1002_v8, %v1003_v33  ;;  %v2573_v51 = vmax.f32 %v1280_v21, %v1281_v34 }
 0x16c   : > { %v1055_v52 = vmax.f32 %v1053_v9, %v1054_v13  ;;  %v1115_v36 = vrot.slane %v1114_v10, 4  ;;  %v1138_v42 = vsel %vm852_vm6, %v1108_v58, -inf  ;;  %v1139_v39 = vsel %vm854_vm7, %v2553_v2, -inf }
 0x16d   : > { %v1080_v3 = vrot.slane %v1079_v37, 2  ;;  %v1130_v53 = vsel %vm843_vm5, %v1108_v58, -inf  ;;  %v1005_v27 = vadd.f32 %v1004_v50, %v995_v48  ;;  %v1072_v43 = vrot.slane %v1071_v44, 2 }
 0x16e   : > { %v1063_v56 = vmax.f32 %v1061_v12, %v1062_v35  ;;  %v1088_v57 = vrot.slane %v1087_v0, 2  ;;  %v1095_v59 = vmax.f32 %v1093_v41, %v1094_v6  ;;  %v1123_v29 = vrot.slane %v1122_v22, 4 }
 0x16f   : > { %v1020_v17 = vmax.f32 %v2543_v54, %v1019_v7  ;;  %v1048_v60 = vrot.slane %v1047_v45, 1  ;;  %v1013_v61 = vadd.f32 %v1012_v30, %v1005_v27  ;;  %v1140_v32 = vmax.f32 %v1138_v42, %v1139_v39 }
 0x170   : > { %v1028_v1 = vmax.f32 %v1026_v63, %v1027_v55  ;;  %v1056_v20 = vrot.slane %v1055_v52, 1  ;;  %v1116_v4 = vmax.f32 %v1114_v10, %v1115_v36  ;;  %v1131_v46 = vrot.slane %v1130_v53, 4 }
 0x171   : > { %v1081_v5 = vmax.f32 %v1079_v37, %v1080_v3  ;;  %v1148_v31 = vsel %vm535_vm1, %v2553_v2, -inf  ;;  %v1021_v58 = vadd.f32 %v1020_v17, %v1013_v61  ;;  %v1073_v8 = vmax.f32 %v1071_v44, %v1072_v43 }
 0x172   : > { %v1064_v9 = vrot.slane %v1063_v56, 1  ;;  %v1089_v12 = vmax.f32 %v1087_v0, %v1088_v57  ;;  %v1096_v14 = vrot.slane %v1095_v59, 2  ;;  %v1124_v18 = vmax.f32 %v1122_v22, %v1123_v29 }
 0x173   : > { %v1049_v19 = vmax.f32 %v1047_v45, %v1048_v60  ;;  %v1029_v23 = vadd.f32 %v1028_v1, %v1021_v58  ;;  %v1141_v54 = vrot.slane %v1140_v32, 4  ;;  %v1156_v7 = vsel %vm834_vm3, %v2553_v2, -inf }
 0x174   : > { %v1117_v63 = vrot.slane %v1116_v4, 2  ;;  %v1132_v11 = vmax.f32 %v1130_v53, %v1131_v46  ;;  %v1149_v55 = vrot.slane %v1148_v31, 4  ;;  %v1057_v25 = vmax.f32 %v1055_v52, %v1056_v20 }
 0x175   : > { %v1082_v26 = vrot.slane %v1081_v5, 1  ;;  %v1050_v28 = vadd.f32 %v1049_v19, %v1029_v23  ;;  %v1074_v30 = vrot.slane %v1073_v8, 1  ;;  %v1097_v41 = vmax.f32 %v1095_v59, %v1096_v14 }
 0x176   : > { %v1125_v15 = vrot.slane %v1124_v18, 2  ;;  %v1157_v33 = vrot.slane %v1156_v7, 4  ;;  %v1164_v13 = vsel %vm843_vm5, %v2553_v2, -inf  ;;  %v1065_v35 = vmax.f32 %v1063_v56, %v1064_v9 }
 0x177   : > { %v1090_v37 = vrot.slane %v1089_v12, 1  ;;  %v1058_v10 = vadd.f32 %v1057_v25, %v1050_v28  ;;  %v1142_v49 = vmax.f32 %v1140_v32, %v1141_v54  ;;  %v1118_v44 = vmax.f32 %v1116_v4, %v1117_v63 }
 0x178   : > { %v1133_v21 = vrot.slane %v1132_v11, 2  ;;  %v1150_v45 = vmax.f32 %v1148_v31, %v1149_v55  ;;  %v1185_v0 = vsel %vm535_vm1, %v2516_v16, -inf  ;;  %v1083_v6 = vmax.f32 %v1081_v5, %v1082_v26 }
 0x179   : > { %v1066_v34 = vadd.f32 %v1065_v35, %v1058_v10  ;;  %v1075_v22 = vmax.f32 %v1073_v8, %v1074_v30  ;;  %v1165_v48 = vrot.slane %v1164_v13, 4  ;;  %v1098_v50 = vrot.slane %v1097_v41, 1 }
 0x17a   : > { %v1126_v52 = vmax.f32 %v1124_v18, %v1125_v15  ;;  %v1158_v36 = vmax.f32 %v1156_v7, %v1157_v33  ;;  %v1193_v2 = vsel %vm834_vm3, %v2516_v16, -inf  ;;  %v1143_v39 = vrot.slane %v1142_v49, 2 }
 0x17b   : > { %v1076_v42 = vadd.f32 %v1075_v22, %v1066_v34  ;;  %v1186_v3 = vrot.slane %v1185_v0, 4  ;;  %v1201_v53 = vsel %vm843_vm5, %v2516_v16, -inf  ;;  %v1119_v27 = vrot.slane %v1118_v44, 1 }
 0x17c   : > { %v1134_v43 = vmax.f32 %v1132_v11, %v1133_v21  ;;  %v1151_v56 = vrot.slane %v1150_v45, 2  ;;  %v1091_v57 = vmax.f32 %v1089_v12, %v1090_v37  ;;  %v1166_v29 = vmax.f32 %v1164_v13, %v1165_v48 }
 0x17d   : > { %v1084_v59 = vadd.f32 %v1083_v6, %v1076_v42  ;;  %v1194_v17 = vrot.slane %v1193_v2, 4  ;;  %v1099_v60 = vmax.f32 %v1097_v41, %v1098_v50  ;;  %v1127_v61 = vrot.slane %v1126_v52, 1 }
 0x17e   : > { %v1159_v32 = vrot.slane %v1158_v36, 2  ;;  %v1202_v1 = vrot.slane %v1201_v53, 4  ;;  %v1144_v4 = vmax.f32 %v1142_v49, %v1143_v39  ;;  %v1187_v46 = vmax.f32 %v1185_v0, %v1186_v3 }
 0x17f   : > { %v1092_v20 = vadd.f32 %v1091_v57, %v1084_v59  ;;  %v1219_v5 = vsel %vm535_vm1, %v2520_v47, -inf  ;;  %v1120_v31 = vmax.f32 %v1118_v44, %v1119_v27  ;;  %v1135_v58 = vrot.slane %v1134_v43, 1 }
 0x180   : > { %v1152_v16 = vmax.f32 %v1150_v45, %v1151_v56  ;;  %v1212_v8 = vrot.slane %v2533_v38, 4  ;;  %v1167_v12 = vrot.slane %v1166_v29, 2  ;;  %v1195_v14 = vmax.f32 %v1193_v2, %v1194_v17 }
 0x181   : > { %v1100_v9 = vadd.f32 %v1099_v60, %v1092_v20  ;;  %v1227_v18 = vsel %vm834_vm3, %v2520_v47, -inf  ;;  %v1128_v19 = vmax.f32 %v1126_v52, %v1127_v61  ;;  %v1160_v23 = vmax.f32 %v1158_v36, %v1159_v32 }
 0x182   : > { %v1203_v54 = vmax.f32 %v1201_v53, %v1202_v1  ;;  %v1220_v7 = vrot.slane %v1219_v5, 4  ;;  %v1145_v11 = vrot.slane %v1144_v4, 1  ;;  %v1188_v55 = vrot.slane %v1187_v46, 2 }
 0x183   : > { %v1121_v63 = vadd.f32 %v1120_v31, %v1100_v9  ;;  %v1235_v25 = vsel %vm843_vm5, %v2520_v47, -inf  ;;  %v1136_v26 = vmax.f32 %v1134_v43, %v1135_v58  ;;  %v1153_v28 = vrot.slane %v1152_v16, 1 }
 0x184   : > { %v1213_v30 = vmax.f32 %v2533_v38, %v1212_v8  ;;  %v1228_v41 = vrot.slane %v1227_v18, 4  ;;  %v1168_v33 = vmax.f32 %v1166_v29, %v1167_v12  ;;  %v1196_v13 = vrot.slane %v1195_v14, 2 }
 0x185   : > { %v1129_v15 = vadd.f32 %v1128_v19, %v1121_v63  ;;  %v1256_v35 = vsel %vm535_vm1, %v2559_v24, -inf  ;;  %v1204_v37 = vrot.slane %v1203_v54, 2  ;;  %v1221_v10 = vmax.f32 %v1219_v5, %v1220_v7 }
 0x186   : > { %v1236_v49 = vrot.slane %v1235_v25, 4  ;;  %v1146_v21 = vmax.f32 %v1144_v4, %v1145_v11  ;;  %v1161_v45 = vrot.slane %v1160_v23, 1  ;;  %v1189_v0 = vmax.f32 %v1187_v46, %v1188_v55 }
 0x187   : > { %v1137_v44 = vadd.f32 %v1136_v26, %v1129_v15  ;;  %v1214_v6 = vrot.slane %v1213_v30, 2  ;;  %v1229_v47 = vmax.f32 %v1227_v18, %v1228_v41  ;;  %v1257_v34 = vrot.slane %v1256_v35, 4 }
 0x188   : > { %v1264_v38 = vsel %vm834_vm3, %v2559_v24, -inf  ;;  %v1154_v48 = vmax.f32 %v1152_v16, %v1153_v28  ;;  %v1169_v50 = vrot.slane %v1168_v33, 1  ;;  %v1197_v52 = vmax.f32 %v1195_v14, %v1196_v13 }
 0x189   : > { %v1147_v22 = vadd.f32 %v1146_v21, %v1137_v44  ;;  %v1205_v36 = vmax.f32 %v1203_v54, %v1204_v37  ;;  %v1222_v2 = vrot.slane %v1221_v10, 2  ;;  %v1237_v42 = vmax.f32 %v1235_v25, %v1236_v49 }
 0x18a   : > { %v1272_v39 = vsel %vm843_vm5, %v2559_v24, -inf  ;;  %v1162_v53 = vmax.f32 %v1160_v23, %v1161_v45  ;;  %v1190_v27 = vrot.slane %v1189_v0, 1  ;;  %v1265_v43 = vrot.slane %v1264_v38, 4 }
 0x18b   : > { %v1155_v3 = vadd.f32 %v1154_v48, %v1147_v22  ;;  %v1215_v56 = vmax.f32 %v1213_v30, %v1214_v6  ;;  %v1230_v57 = vrot.slane %v1229_v47, 2  ;;  %v1258_v59 = vmax.f32 %v1256_v35, %v1257_v34 }
 0x18c   : > { %v1170_v17 = vmax.f32 %v1168_v33, %v1169_v50  ;;  %v1198_v60 = vrot.slane %v1197_v52, 1  ;;  %v1273_v61 = vrot.slane %v1272_v39, 4  ;;  %v1206_v32 = vrot.slane %v1205_v36, 1 }
 0x18d   : > { %v1163_v29 = vadd.f32 %v1162_v53, %v1155_v3  ;;  %v1223_v1 = vmax.f32 %v1221_v10, %v1222_v2  ;;  %v1238_v20 = vrot.slane %v1237_v42, 2  ;;  %v1290_v4 = vsel %vm535_vm1, %v2565_v40, -inf }
 0x18e   : > { %v1191_v5 = vmax.f32 %v1189_v0, %v1190_v27  ;;  %v1266_v24 = vmax.f32 %v1264_v38, %v1265_v43  ;;  %v1283_v31 = vrot.slane %v2573_v51, 4  ;;  %v1216_v58 = vrot.slane %v1215_v56, 1 }
 0x18f   : > { %v1171_v46 = vadd.f32 %v1170_v17, %v1163_v29  ;;  %v1231_v16 = vmax.f32 %v1229_v47, %v1230_v57  ;;  %v1259_v8 = vrot.slane %v1258_v59, 2  ;;  %v1298_v9 = vsel %vm834_vm3, %v2565_v40, -inf }
 0x190   : > { %v1199_v14 = vmax.f32 %v1197_v52, %v1198_v60  ;;  %v1274_v18 = vmax.f32 %v1272_v39, %v1273_v61  ;;  %v1291_v19 = vrot.slane %v1290_v4, 4  ;;  %v1207_v23 = vmax.f32 %v1205_v36, %v1206_v32 }
 0x191   : > { %v1192_v12 = vadd.f32 %v1191_v5, %v1171_v46  ;;  %v1224_v54 = vrot.slane %v1223_v1, 1  ;;  %v1239_v7 = vmax.f32 %v1237_v42, %v1238_v20  ;;  %v1306_v63 = vsel %vm843_vm5, %v2565_v40, -inf }
 0x192   : > { %v1267_v55 = vrot.slane %v1266_v24, 2  ;;  %v1284_v25 = vmax.f32 %v2573_v51, %v1283_v31  ;;  %v1299_v26 = vrot.slane %v1298_v9, 4  ;;  %v1217_v28 = vmax.f32 %v1215_v56, %v1216_v58 }
 0x193   : > { %v1200_v11 = vadd.f32 %v1199_v14, %v1192_v12  ;;  %v1232_v30 = vrot.slane %v1231_v16, 1  ;;  %v1260_v41 = vmax.f32 %v1258_v59, %v1259_v8  ;;  %v1275_v33 = vrot.slane %v1274_v18, 2  ;;  %v1404_v8 = vld [vmem:[%s2697_s6] sm:$0xf] }
 0x194   : > { %v1292_v13 = vmax.f32 %v1290_v4, %v1291_v19  ;;  %v1307_v35 = vrot.slane %v1306_v63, 4  ;;  %v1225_v37 = vmax.f32 %v1223_v1, %v1224_v54  ;;  %v1240_v10 = vrot.slane %v1239_v7, 1  ;;  %v1486_v12 = vld [vmem:[%s2700_s9] sm:$0x3] }
 0x195   : > { %v1208_v15 = vadd.f32 %v1207_v23, %v1200_v11  ;;  %v1268_v44 = vmax.f32 %v1266_v24, %v1267_v55  ;;  %v1285_v21 = vrot.slane %v1284_v25, 2  ;;  %v1300_v45 = vmax.f32 %v1298_v9, %v1299_v26  ;;  %v1403_v9 = vld [vmem:[%s397_s12] sm:$0x1]  ;;  %s1950_s12 = scalar_lea.vmem %s2651_s15, 16 }
 0x196   : > { %v1233_v0 = vmax.f32 %v1231_v16, %v1232_v30  ;;  %v1261_v40 = vrot.slane %v1260_v41, 1  ;;  %v1276_v47 = vmax.f32 %v1274_v18, %v1275_v33  ;;  %v1293_v34 = vrot.slane %v1292_v13, 2  ;;  %v1405_v19 = vld [vmem:[%s2698_s7] sm:$0x1]  ;;  %p1951_p11 = scmp.ne.s32.totalorder %s2651_s15, %s1950_s12  ;;  %p1958_p1 = scmp.lt.s32.totalorder %s1956_s0, %s1950_s12 }
 0x197   : > { %v1218_v49 = vadd.f32 %v1217_v28, %v1208_v15  ;;  %v1308_v51 = vmax.f32 %v1306_v63, %v1307_v35  ;;  %v1241_v38 = vmax.f32 %v1239_v7, %v1240_v10  ;;  %v1269_v48 = vrot.slane %v1268_v44, 1  ;;  %v1331_v23 = vld [vmem:[%s2696_s5] sm:$0x1] }
 0x198   : > { %v1286_v50 = vmax.f32 %v1284_v25, %v1285_v21  ;;  %v1301_v52 = vrot.slane %v1300_v45, 2  ;;  %v1262_v36 = vmax.f32 %v1260_v41, %v1261_v40  ;;  %v1277_v42 = vrot.slane %v1276_v47, 1  ;;  %v1485_v25 = vld [vmem:[%s2699_s8] sm:$0x3f]  ;;  %p1952_p12 = pnand %p1951_p11, %p2116_p5  ;;  %p1959_p2 = por %p1958_p1, %p1957_p0 }
 0x199   : > { %v1226_v6 = vadd.f32 %v1225_v37, %v1218_v49  ;;  %v1294_v39 = vmax.f32 %v1292_v13, %v1293_v34  ;;  %v1309_v3 = vrot.slane %v1308_v51, 2  ;;  %v1270_v27 = vmax.f32 %v1268_v44, %v1269_v48  ;;  %v1643_v15 = vld [vmem:[%s2701_s10] sm:$0x1] }
 0x19a   : > { %v1287_v43 = vrot.slane %v1286_v50, 1  ;;  %v1302_v56 = vmax.f32 %v1300_v45, %v1301_v52  ;;  %v1278_v59 = vmax.f32 %v1276_v47, %v1277_v42  ;;  %p1953_p13 = pneg %p1952_p12 }
 0x19b   : > { %v1234_v22 = vadd.f32 %v1233_v0, %v1226_v6  ;;  %v1295_v29 = vrot.slane %v1294_v39, 1  ;;  %v1310_v17 = vmax.f32 %v1308_v51, %v1309_v3 }
 0x19c   : > { %v1288_v61 = vmax.f32 %v1286_v50, %v1287_v43  ;;  %v1303_v32 = vrot.slane %v1302_v56, 1  ;;  %p1960_p3 = pnand %p1959_p2, %p1953_p13 }
 0x19d   : > { %v1242_v2 = vadd.f32 %v1241_v38, %v1234_v22  ;;  %v1296_v20 = vmax.f32 %v1294_v39, %v1295_v29  ;;  %v1311_v4 = vrot.slane %v1310_v17, 1 }
 0x19e   : > { %v1304_v5 = vmax.f32 %v1302_v56, %v1303_v32 }
 0x19f   : > { %v1263_v53 = vadd.f32 %v1262_v36, %v1242_v2  ;;  %v1312_v31 = vmax.f32 %v1310_v17, %v1311_v4 }
 0x1a1   : > { %v1271_v57 = vadd.f32 %v1270_v27, %v1263_v53 }
 0x1a3   : > { %v1279_v60 = vadd.f32 %v1278_v59, %v1271_v57 }
 0x1a5   : > { %v1289_v1 = vadd.f32 %v1288_v61, %v1279_v60 }
 0x1a7   : > { %v1297_v46 = vadd.f32 %v1296_v20, %v1289_v1 }
 0x1a9   : > { %v1305_v24 = vadd.f32 %v1304_v5, %v1297_v46 }
 0x1ab   : > { %v1313_v58 = vadd.f32 %v1312_v31, %v1305_v24 }
 0x1ad   : > { %v1314_v16 = vmul.f32 0.020408163, %v1313_v58 }
 0x1af   : > { %1818 = vmatmul.mubr.f32.vlgmr.msra.gmra.mrb[18].mxu1 %v1314_v16 }
 0x1b0   : > { %1821 = vmatpush3.msk.msra.mxu1 %vm1410_vm8, %v1404_v8  ;;  %1822 = vmatprep.mubr.msk.f32.mxu1 %vm2016_vm2, %v2547_v62 }
 0x1b1   : > { %1825 = vmatprep.subr.mxu1 %v2547_v62 }
 0x1b3   : > { %1823 = vmatmul.mubr.msk.f32.vlgmr.msra.gmra.mrb[20].mxu1 %vm1406_vm9, %v1403_v9 }
 0x1b4   : > { %1827 = vmatprep.mubr.msk.f32.mxu1 %vm2016_vm2, %v2547_v62  ;;  %1826 = vmatpush3.msk.msra.mxu1 %vm1491_vm10, %v1486_v12 }
 0x1b5   : > { %1830 = vmatprep.subr.mxu1 %v2547_v62 }
 0x282   : > { %v1398_v14 = vpop.f32.mrb[18].mxu1 }
 0x283   : > { %v1819_v18 = vpop.f32.mrb[19].mxu1  ;;  %v1399_v11 = vadd.f32 %v1398_v14, %v1331_v23 }
 0x285   : > { %v1402_v26 = vmax.f32 %v1399_v11, 0.0 }
 0x286   : > { %v1480_v54 = vpop.f32.mrb[20].mxu1 }
 0x287   : > { %v1481_v7 = vadd.f32 %v1480_v54, %v1405_v19  ;;  %v1824_v63 = vpop.f32.mrb[21].mxu1 }
 0x289   : > { %v1484_v55 = vmax.f32 %v1481_v7, 0.0 }
 0x28b   : > { %1828 = vmatmul.mubr.msk.f32.vlgmr.msra.gmra.mrb[22].mxu1 %vm1487_vm11, %v1484_v55 }
 0x28c   : > { %1831 = vmatpush3.msk.msra.mxu1 %vm1569_vm12, %v1485_v25  ;;  %1832 = vmatprep.mubr.msk.f32.mxu1 %vm2016_vm2, %v2547_v62 }
 0x28f   : > { %1833 = vmatmul.mubr.msk.f32.vlgmr.msra.gmra.mrb[24].mxu1 %vm1565_vm13, %v1402_v26 }
 0x35e   : > { %v1561_v28 = vpop.f32.mrb[22].mxu1 }
 0x35f   : > { %v1829_v30 = vpop.f32.mrb[23].mxu1 }
 0x362   : > { %v1639_v41 = vpop.f32.mrb[24].mxu1 }
 0x363   : > { %v1640_v33 = vadd.f32 %v1639_v41, %v1561_v28  ;;  %v1834_v13 = vpop.f32.mrb[25].mxu1 }
 0x365   : > { %v1644_v35 = vadd.f32 %v1643_v15, %v1640_v33 }
 0x367   : > { %1646 = vst.msk [vmem:[%s389_s24] sm:$0x1] %vm1645_vm14, %v1644_v35 }
 0x368   : > { %1963 = shalt.err (!%p1960_p3)
}
 0x369   : > { %s1964_s30 = scalar_lea.hbm %s2649_s16, 16  ;;  %s1968_s22 = scalar_lea.hbm %s2702_s11, 32 }
 0x36a   : > { %p1965_p4 = scmp.ne.s32.totalorder %s2649_s16, %s1964_s30  ;;  %p1969_p9 = scmp.lt.u32.totalorder %s2649_s16, %s2702_s11 }
 0x36b   : > { %p1970_p10 = scmp.lt.u32.totalorder %s1968_s22, %s1964_s30  ;;  %p1972_p12 = scmp.lt.u32.totalorder %s1964_s30, %s2649_s16 }
 0x36c   : > { %p1966_p7 = pnand %p1965_p4, %p2116_p5 }
 0x36d   : > { %p1971_p11 = por %p1970_p10, %p1969_p9 }
 0x36e   : > { %p1967_p8 = pneg %p1966_p7 }
 0x36f   : > { %p1973_p13 = por %p1972_p12, %p1971_p11 }
 0x371   : > { %p1974_p0 = pnand %p1973_p13, %p1967_p8 }
 0x373   : > { %1977 = shalt.err (!%p1974_p0)
}
 0x374   : > { %1907 = dma.vmem_to_hbm [thread:$0]  (%p2116_p5), %s2651_s15, 16, %s2649_s16, %s1648_s29  }
 0x375 PF: > { %p1913_p1 = scmp.ge.s32.totalorder %s2012_s20, 2  ;;  %s1672_s0 = sand.u32 1, %s2000_s17  }
 0x376   : > { %s1673_s12 = scalar_lea.sflag [#allocation4], %s1672_s0 }
 0x377   : > { %p1910_p2 = pnand %p1913_p1, %p2120_p6 }
 0x379   : > { %1995 = dma.done.wait (!%p1910_p2), %s1673_s12, 16  }
 0x37a   : > { %1997 = vsyncadd (!%p1910_p2), %s1673_s12, 4294967280  ;;  %p21_p3 = scmp.ge.s32.totalorder %s2103_s23, 4   ;;  %s2707_s17 = smov %s2004_s18 }
 0x37b   : > { %s2708_s18 = smov %s2008_s19  ;;  %s2709_s19 = smov %s2114_s26 }
 0x37c   : > { %s2710_s20 = smov %s2103_s23  ;;  %23 = sbr.rel (!%p21_p3) target bundleno = 5 (0x5), region = 115 }
 0x383   :  { %1677 = vsyncpa [#allocation4], 1 }
 0x384   :  { %1679 = vsyncpa [#allocation4 + $0x1], 1 }

</bundles_post_ra>
